<compile_context>
chip_gen: v5e
topology: v5e:2x2
jax: 0.10.0
libtpu: 0.0.40
codegen_flags: <defaults>
</compile_context>

<pallas_src>
import functools

import jax
import jax.numpy as jnp
from jax.experimental import pallas as pl
from jax.experimental.pallas import tpu as pltpu

# ---- module hyper-params (consistent with the MoEFeedForward cfg used in the test) ----
EMB_DIM = 64
NUM_EXPERTS = 8
NUM_EXPERTS_PER_TOK = 2
MOE_INTERMEDIATE = 128            # multiple of 128 -> lane-aligned split of the fused fc1|fc2 output


def _round_up(a, m):
    return (a + m - 1) // m * m


def _pick_token_tile(n):
    # Big tiles amortize the ~0.35 us/step overhead; keep >=2 tiles when possible so the
    # "parallel" token axis can shard across the 2 TensorCores on v7x.
    if n >= 1024:
        return 512
    if n >= 512:
        return 256
    return max(8, _round_up(n, 8))


# --------------------------------------------------------------------------------------
# Fused MoE FFN kernel.
#   grid = (token_tiles,)  ["parallel"]
#   Resident per grid step:  x tile (tm, D), gating tile (tm, E), ALL expert weights
#   (E, D, 2I) and (E, I, D) in bf16, VMEM f32 accumulator (tm, D).
#   Per expert e (Python-unrolled, skipped if no token in this tile routes to it):
#       h      = x_bf16 @ [W1|W2]_e          (tm, 2I)   single lane-dense MXU matmul
#       hidden = silu(h[:, :I]) * h[:, I:]   (tm, I)
#       acc   += gate[:, e:e+1] * (hidden_bf16 @ W3_e)
# --------------------------------------------------------------------------------------
def _moe_expert_kernel(act_ref, x_ref, w13_ref, w3_ref, g_ref, o_ref, acc_ref, *,
                       inter, num_experts):
    i = pl.program_id(0)

    acc_ref[...] = jnp.zeros_like(acc_ref)
    x = x_ref[...].astype(jnp.bfloat16)                                   # (tm, D) bf16 for MXU
    g = g_ref[...].astype(jnp.float32)                                    # (tm, E) lane-dense gate

    for e in range(num_experts):
        # Skip experts with zero gate weight across the whole tile (bit-identical: their
        # contribution is exactly zero). Flag comes from SMEM scalar prefetch.
        @pl.when(act_ref[i, e] > 0)
        def _(e=e):
            h = jnp.dot(x, w13_ref[e], preferred_element_type=jnp.float32)   # (tm, 2I)
            h1 = h[:, :inter]
            h2 = h[:, inter:]
            hidden = (h1 * jax.nn.sigmoid(h1)) * h2                          # SiLU(fc1) * fc2, f32 VPU
            out = jnp.dot(hidden.astype(jnp.bfloat16), w3_ref[e],
                          preferred_element_type=jnp.float32)                # (tm, D)
            acc_ref[...] += g[:, e:e + 1] * out

    o_ref[...] = acc_ref[...].astype(o_ref.dtype)


def moe_experts(x2d, w13_bf16, w3_bf16, gating, tile_active, tm):
    n, d = x2d.shape
    num_experts, _, two_i = w13_bf16.shape
    inter = two_i // 2
    return pl.pallas_call(
        functools.partial(_moe_expert_kernel, inter=inter, num_experts=num_experts),
        out_shape=jax.ShapeDtypeStruct((n, d), x2d.dtype),
        grid_spec=pltpu.PrefetchScalarGridSpec(
            num_scalar_prefetch=1,                 # tile_active -> SMEM, drives pl.when skips
            grid=(n // tm,),
            in_specs=[
                pl.BlockSpec((tm, d), lambda i, act: (i, 0)),                     # x tile
                pl.BlockSpec((num_experts, d, two_i), lambda i, act: (0, 0, 0)),  # ALL fc1|fc2 (resident)
                pl.BlockSpec((num_experts, inter, d), lambda i, act: (0, 0, 0)),  # ALL fc3   (resident)
                pl.BlockSpec((tm, num_experts), lambda i, act: (i, 0)),           # dense gate probs
            ],
            out_specs=pl.BlockSpec((tm, d), lambda i, act: (i, 0)),
            scratch_shapes=[pltpu.VMEM((tm, d), jnp.float32)],                    # f32 accumulator
        ),
        compiler_params=pltpu.CompilerParams(
            dimension_semantics=("parallel",)),
    )(tile_active, x2d, w13_bf16, w3_bf16, gating)


# --------------------------------------------------------------------------------------
# Forward pass
# --------------------------------------------------------------------------------------
def moe_forward(x, params):
    b, t, d = x.shape
    n = b * t
    num_experts = params["w_gate"].shape[1]
    k = NUM_EXPERTS_PER_TOK

    x2d = x.reshape(n, d)

    # Gate projection + routing in plain JAX (tiny (n,D)@(D,E) matmul; XLA fuses it with
    # the routing math — a dedicated pallas_call here is pure overhead).
    # TODO(synk): torch.topk + softmax + scatter_ routing is data-dependent select/scatter;
    #             done with jax.lax.top_k / one_hot in the wrapper rather than in a kernel.
    scores = jnp.dot(x2d, params["w_gate"])
    topk_vals, topk_idx = jax.lax.top_k(scores, k)
    topk_probs = jax.nn.softmax(topk_vals.astype(jnp.float32), axis=-1)
    gating = jnp.sum(
        jax.nn.one_hot(topk_idx, num_experts, dtype=jnp.float32) * topk_probs[..., None],
        axis=-2,
    )                                                                     # (n, E) dense gate probs

    tm = _pick_token_tile(n)
    n_pad = _round_up(n, tm)
    if n_pad != n:
        x2d = jnp.pad(x2d, ((0, n_pad - n), (0, 0)))
        gating = jnp.pad(gating, ((0, n_pad - n), (0, 0)))

    # Per-(token-tile, expert) activity flags (softmax probs are strictly > 0 for selected
    # experts, exactly 0 otherwise, so >0 identifies routed experts; padded rows are all 0).
    tile_active = (gating.reshape(n_pad // tm, tm, num_experts) > 0.0).any(axis=1).astype(jnp.int32)

    y2d = moe_experts(
        x2d,
        params["w13"].astype(jnp.bfloat16),   # bf16 weights: bf16-native MXU + half the DMA/VMEM
        params["w3"].astype(jnp.bfloat16),
        gating, tile_active, tm)
    return y2d[:n].reshape(b, t, d)


# --------------------------------------------------------------------------------------
# Pure-JAX f32 reference (mirrors the PyTorch forward; for in-script correctness check only)
# --------------------------------------------------------------------------------------
def reference_forward(x, params):
    b, t, d = x.shape
    num_experts = params["w_gate"].shape[1]
    k = NUM_EXPERTS_PER_TOK

    scores = x @ params["w_gate"]                                         # (b, t, E)
    topk_vals, topk_idx = jax.lax.top_k(scores, k)
    topk_probs = jax.nn.softmax(topk_vals, axis=-1)

    expert_outs = []
    for e in range(num_experts):
        hidden = jax.nn.silu(x @ params["w1"][e]) * (x @ params["w2"][e])
        expert_outs.append((hidden @ params["w3"][e])[..., None, :])
    expert_outs = jnp.concatenate(expert_outs, axis=-2)                   # (b, t, E, D)

    gating = jnp.zeros((b, t, num_experts), dtype=x.dtype)
    for i in range(k):                                                    # scatter_ equivalent
        oh = jax.nn.one_hot(topk_idx[..., i], num_experts, dtype=x.dtype)
        gating = gating * (1.0 - oh) + oh * topk_probs[..., i:i + 1]
    y = jnp.sum(gating[..., None] * expert_outs, axis=-2)
    return y


if __name__ == "__main__":
    B, T = 2, 8
    key = jax.random.PRNGKey(0)
    kx, kg, k1, k2, k3 = jax.random.split(key, 5)

    x = jax.random.normal(kx, (B, T, EMB_DIM), dtype=jnp.float32)

    # Linear weights stored pre-transposed as (in, out); fc1|fc2 fused along the output dim.
    w_gate = 0.1 * jax.random.normal(kg, (EMB_DIM, NUM_EXPERTS), dtype=jnp.float32)
    w1 = 0.1 * jax.random.normal(k1, (NUM_EXPERTS, EMB_DIM, MOE_INTERMEDIATE), dtype=jnp.float32)
    w2 = 0.1 * jax.random.normal(k2, (NUM_EXPERTS, EMB_DIM, MOE_INTERMEDIATE), dtype=jnp.float32)
    w3 = 0.1 * jax.random.normal(k3, (NUM_EXPERTS, MOE_INTERMEDIATE, EMB_DIM), dtype=jnp.float32)

    params = {
        "w_gate": w_gate,
        "w13": jnp.concatenate([w1, w2], axis=-1),    # (E, D, 2I) fused fc1|fc2
        "w3": w3,                                     # (E, I, D)
    }

    out = jax.block_until_ready(moe_forward(x, params))
    ref = reference_forward(x, {"w_gate": w_gate, "w1": w1, "w2": w2, "w3": w3})

    assert out.shape == (B, T, EMB_DIM) and out.dtype == jnp.float32
    # Tolerance loosened vs. the f32 reference to accommodate bf16 MXU matmuls (expected
    # bf16 rounding, not a routing/accumulation bug).
    max_err = float(jnp.max(jnp.abs(out - ref)))
    assert jnp.allclose(out, ref, atol=3e-2, rtol=3e-2), max_err
    print("KERNEL_OK")
</pallas_src>

<mosaic_0001>
module attributes {stable_mosaic.version = 11 : i64} {
  func.func @_moe_expert_kernel(%arg0: i32, %arg1: memref<1x8xi32, #tpu.memory_space<smem>>, %arg2: memref<16x64xf32, #tpu.memory_space<vmem>>, %arg3: memref<8x64x256xbf16, #tpu.memory_space<vmem>>, %arg4: memref<8x128x64xbf16, #tpu.memory_space<vmem>>, %arg5: memref<16x8xf32, #tpu.memory_space<vmem>>, %arg6: memref<16x64xf32, #tpu.memory_space<vmem>>, %arg7: memref<16x64xf32, #tpu.memory_space<vmem>>) attributes {dimension_semantics = [#tpu.dimension_semantics<parallel>], iteration_bounds = array<i64: 1>, scalar_prefetch = 1 : i64, scratch_operands = 1 : i64, tpu.core_type = #tpu.core_type<tc>, window_params = [{transform_indices = @transform_0, window_bounds = array<i64: 16, 64>}, {pipeline_mode = #tpu.pipeline_mode<synchronous>, transform_indices = @transform_1, window_bounds = array<i64: 8, 64, 256>}, {pipeline_mode = #tpu.pipeline_mode<synchronous>, transform_indices = @transform_2, window_bounds = array<i64: 8, 128, 64>}, {transform_indices = @transform_3, window_bounds = array<i64: 16, 8>}, {transform_indices = @transform_4, window_bounds = array<i64: 16, 64>}]} {
    %cst = arith.constant 0.000000e+00 : f32
    %0 = vector.broadcast %cst : f32 to vector<16x64xf32>
    %c0 = arith.constant 0 : index
    %c0_0 = arith.constant 0 : index
    %1 = vector.load %arg7[%c0, %c0_0] : memref<16x64xf32, #tpu.memory_space<vmem>>, vector<16x64xf32>
    tpu.vector_store %arg7[%c0, %c0_0], %0 {strides = array<i32>} : memref<16x64xf32, #tpu.memory_space<vmem>>, vector<16x64xf32>,
    %c0_1 = arith.constant 0 : index
    %c0_2 = arith.constant 0 : index
    %2 = vector.load %arg2[%c0_1, %c0_2] : memref<16x64xf32, #tpu.memory_space<vmem>>, vector<16x64xf32>
    %3 = arith.truncf %2 : vector<16x64xf32> to vector<16x64xbf16>
    %c0_3 = arith.constant 0 : index
    %c0_4 = arith.constant 0 : index
    %4 = vector.load %arg5[%c0_3, %c0_4] : memref<16x8xf32, #tpu.memory_space<vmem>>, vector<16x8xf32>
    %5 = arith.index_cast %arg0 : i32 to index
    %c0_5 = arith.constant 0 : index
    %6 = memref.load %arg1[%5, %c0_5] : memref<1x8xi32, #tpu.memory_space<smem>>
    %c0_i32 = arith.constant 0 : i32
    %7 = arith.cmpi sgt, %6, %c0_i32 : i32
    %8 = arith.extui %7 : i1 to i32
    %c0_i32_6 = arith.constant 0 : i32
    %9 = arith.cmpi ne, %8, %c0_i32_6 : i32
    scf.if %9 {
      %c0_25 = arith.constant 0 : index
      %c0_26 = arith.constant 0 : index
      %c0_27 = arith.constant 0 : index
      %47 = vector.load %arg3[%c0_25, %c0_26, %c0_27] : memref<8x64x256xbf16, #tpu.memory_space<vmem>>, vector<1x64x256xbf16>
      %48 = vector.shape_cast %47 : vector<1x64x256xbf16> to vector<64x256xbf16>
      %cst_28 = arith.constant dense<0.000000e+00> : vector<16x256xf32>
      %49 = tpu.matmul %3, %48, %cst_28 {dimension_numbers = #tpu.dot_dimension_numbers<[1], [0], [0], [1], [0, 0, 1, 1], [], []>} : vector<16x64xbf16>, vector<64x256xbf16>, vector<16x256xf32> -> vector<16x256xf32>
      %50 = vector.extract_strided_slice %49 {offsets = [0, 0], sizes = [16, 128], strides = [1, 1]} : vector<16x256xf32> to vector<16x128xf32>
      %51 = vector.extract_strided_slice %49 {offsets = [0, 128], sizes = [16, 128], strides = [1, 1]} : vector<16x256xf32> to vector<16x128xf32>
      %52 = arith.negf %50 : vector<16x128xf32>
      %53 = math.exp %52 : vector<16x128xf32>
      %cst_29 = arith.constant 1.000000e+00 : f32
      %54 = vector.broadcast %cst_29 : f32 to vector<16x128xf32>
      %55 = arith.addf %54, %53 : vector<16x128xf32>
      %56 = arith.divf %54, %55 : vector<16x128xf32>
      %57 = arith.mulf %50, %56 : vector<16x128xf32>
      %58 = arith.mulf %57, %51 : vector<16x128xf32>
      %59 = arith.truncf %58 : vector<16x128xf32> to vector<16x128xbf16>
      %c0_30 = arith.constant 0 : index
      %c0_31 = arith.constant 0 : index
      %c0_32 = arith.constant 0 : index
      %60 = vector.load %arg4[%c0_30, %c0_31, %c0_32] : memref<8x128x64xbf16, #tpu.memory_space<vmem>>, vector<1x128x64xbf16>
      %61 = vector.shape_cast %60 : vector<1x128x64xbf16> to vector<128x64xbf16>
      %cst_33 = arith.constant dense<0.000000e+00> : vector<16x64xf32>
      %62 = tpu.matmul %59, %61, %cst_33 {dimension_numbers = #tpu.dot_dimension_numbers<[1], [0], [0], [1], [0, 0, 1, 1], [], []>} : vector<16x128xbf16>, vector<128x64xbf16>, vector<16x64xf32> -> vector<16x64xf32>
      %c0_34 = arith.constant 0 : index
      %c0_35 = arith.constant 0 : index
      %63 = vector.load %arg7[%c0_34, %c0_35] : memref<16x64xf32, #tpu.memory_space<vmem>>, vector<16x64xf32>
      %64 = vector.extract_strided_slice %4 {offsets = [0, 0], sizes = [16, 1], strides = [1, 1]} : vector<16x8xf32> to vector<16x1xf32>
      %65 = vector.broadcast %64 : vector<16x1xf32> to vector<16x64xf32>
      %66 = arith.mulf %65, %62 : vector<16x64xf32>
      %67 = arith.addf %63, %66 : vector<16x64xf32>
      %c0_36 = arith.constant 0 : index
      %c0_37 = arith.constant 0 : index
      %68 = vector.load %arg7[%c0_36, %c0_37] : memref<16x64xf32, #tpu.memory_space<vmem>>, vector<16x64xf32>
      tpu.vector_store %arg7[%c0_36, %c0_37], %67 {strides = array<i32>} : memref<16x64xf32, #tpu.memory_space<vmem>>, vector<16x64xf32>,
    } else {
    }
    %10 = arith.index_cast %arg0 : i32 to index
    %c1 = arith.constant 1 : index
    %11 = memref.load %arg1[%10, %c1] : memref<1x8xi32, #tpu.memory_space<smem>>
    %c0_i32_7 = arith.constant 0 : i32
    %12 = arith.cmpi sgt, %11, %c0_i32_7 : i32
    %13 = arith.extui %12 : i1 to i32
    %c0_i32_8 = arith.constant 0 : i32
    %14 = arith.cmpi ne, %13, %c0_i32_8 : i32
    scf.if %14 {
      %c1_25 = arith.constant 1 : index
      %c0_26 = arith.constant 0 : index
      %c0_27 = arith.constant 0 : index
      %47 = vector.load %arg3[%c1_25, %c0_26, %c0_27] : memref<8x64x256xbf16, #tpu.memory_space<vmem>>, vector<1x64x256xbf16>
      %48 = vector.shape_cast %47 : vector<1x64x256xbf16> to vector<64x256xbf16>
      %cst_28 = arith.constant dense<0.000000e+00> : vector<16x256xf32>
      %49 = tpu.matmul %3, %48, %cst_28 {dimension_numbers = #tpu.dot_dimension_numbers<[1], [0], [0], [1], [0, 0, 1, 1], [], []>} : vector<16x64xbf16>, vector<64x256xbf16>, vector<16x256xf32> -> vector<16x256xf32>
      %50 = vector.extract_strided_slice %49 {offsets = [0, 0], sizes = [16, 128], strides = [1, 1]} : vector<16x256xf32> to vector<16x128xf32>
      %51 = vector.extract_strided_slice %49 {offsets = [0, 128], sizes = [16, 128], strides = [1, 1]} : vector<16x256xf32> to vector<16x128xf32>
      %52 = arith.negf %50 : vector<16x128xf32>
      %53 = math.exp %52 : vector<16x128xf32>
      %cst_29 = arith.constant 1.000000e+00 : f32
      %54 = vector.broadcast %cst_29 : f32 to vector<16x128xf32>
      %55 = arith.addf %54, %53 : vector<16x128xf32>
      %56 = arith.divf %54, %55 : vector<16x128xf32>
      %57 = arith.mulf %50, %56 : vector<16x128xf32>
      %58 = arith.mulf %57, %51 : vector<16x128xf32>
      %59 = arith.truncf %58 : vector<16x128xf32> to vector<16x128xbf16>
      %c1_30 = arith.constant 1 : index
      %c0_31 = arith.constant 0 : index
      %c0_32 = arith.constant 0 : index
      %60 = vector.load %arg4[%c1_30, %c0_31, %c0_32] : memref<8x128x64xbf16, #tpu.memory_space<vmem>>, vector<1x128x64xbf16>
      %61 = vector.shape_cast %60 : vector<1x128x64xbf16> to vector<128x64xbf16>
      %cst_33 = arith.constant dense<0.000000e+00> : vector<16x64xf32>
      %62 = tpu.matmul %59, %61, %cst_33 {dimension_numbers = #tpu.dot_dimension_numbers<[1], [0], [0], [1], [0, 0, 1, 1], [], []>} : vector<16x128xbf16>, vector<128x64xbf16>, vector<16x64xf32> -> vector<16x64xf32>
      %c0_34 = arith.constant 0 : index
      %c0_35 = arith.constant 0 : index
      %63 = vector.load %arg7[%c0_34, %c0_35] : memref<16x64xf32, #tpu.memory_space<vmem>>, vector<16x64xf32>
      %64 = vector.extract_strided_slice %4 {offsets = [0, 1], sizes = [16, 1], strides = [1, 1]} : vector<16x8xf32> to vector<16x1xf32>
      %65 = vector.broadcast %64 : vector<16x1xf32> to vector<16x64xf32>
      %66 = arith.mulf %65, %62 : vector<16x64xf32>
      %67 = arith.addf %63, %66 : vector<16x64xf32>
      %c0_36 = arith.constant 0 : index
      %c0_37 = arith.constant 0 : index
      %68 = vector.load %arg7[%c0_36, %c0_37] : memref<16x64xf32, #tpu.memory_space<vmem>>, vector<16x64xf32>
      tpu.vector_store %arg7[%c0_36, %c0_37], %67 {strides = array<i32>} : memref<16x64xf32, #tpu.memory_space<vmem>>, vector<16x64xf32>,
    } else {
    }
    %15 = arith.index_cast %arg0 : i32 to index
    %c2 = arith.constant 2 : index
    %16 = memref.load %arg1[%15, %c2] : memref<1x8xi32, #tpu.memory_space<smem>>
    %c0_i32_9 = arith.constant 0 : i32
    %17 = arith.cmpi sgt, %16, %c0_i32_9 : i32
    %18 = arith.extui %17 : i1 to i32
    %c0_i32_10 = arith.constant 0 : i32
    %19 = arith.cmpi ne, %18, %c0_i32_10 : i32
    scf.if %19 {
      %c2_25 = arith.constant 2 : index
      %c0_26 = arith.constant 0 : index
      %c0_27 = arith.constant 0 : index
      %47 = vector.load %arg3[%c2_25, %c0_26, %c0_27] : memref<8x64x256xbf16, #tpu.memory_space<vmem>>, vector<1x64x256xbf16>
      %48 = vector.shape_cast %47 : vector<1x64x256xbf16> to vector<64x256xbf16>
      %cst_28 = arith.constant dense<0.000000e+00> : vector<16x256xf32>
      %49 = tpu.matmul %3, %48, %cst_28 {dimension_numbers = #tpu.dot_dimension_numbers<[1], [0], [0], [1], [0, 0, 1, 1], [], []>} : vector<16x64xbf16>, vector<64x256xbf16>, vector<16x256xf32> -> vector<16x256xf32>
      %50 = vector.extract_strided_slice %49 {offsets = [0, 0], sizes = [16, 128], strides = [1, 1]} : vector<16x256xf32> to vector<16x128xf32>
      %51 = vector.extract_strided_slice %49 {offsets = [0, 128], sizes = [16, 128], strides = [1, 1]} : vector<16x256xf32> to vector<16x128xf32>
      %52 = arith.negf %50 : vector<16x128xf32>
      %53 = math.exp %52 : vector<16x128xf32>
      %cst_29 = arith.constant 1.000000e+00 : f32
      %54 = vector.broadcast %cst_29 : f32 to vector<16x128xf32>
      %55 = arith.addf %54, %53 : vector<16x128xf32>
      %56 = arith.divf %54, %55 : vector<16x128xf32>
      %57 = arith.mulf %50, %56 : vector<16x128xf32>
      %58 = arith.mulf %57, %51 : vector<16x128xf32>
      %59 = arith.truncf %58 : vector<16x128xf32> to vector<16x128xbf16>
      %c2_30 = arith.constant 2 : index
      %c0_31 = arith.constant 0 : index
      %c0_32 = arith.constant 0 : index
      %60 = vector.load %arg4[%c2_30, %c0_31, %c0_32] : memref<8x128x64xbf16, #tpu.memory_space<vmem>>, vector<1x128x64xbf16>
      %61 = vector.shape_cast %60 : vector<1x128x64xbf16> to vector<128x64xbf16>
      %cst_33 = arith.constant dense<0.000000e+00> : vector<16x64xf32>
      %62 = tpu.matmul %59, %61, %cst_33 {dimension_numbers = #tpu.dot_dimension_numbers<[1], [0], [0], [1], [0, 0, 1, 1], [], []>} : vector<16x128xbf16>, vector<128x64xbf16>, vector<16x64xf32> -> vector<16x64xf32>
      %c0_34 = arith.constant 0 : index
      %c0_35 = arith.constant 0 : index
      %63 = vector.load %arg7[%c0_34, %c0_35] : memref<16x64xf32, #tpu.memory_space<vmem>>, vector<16x64xf32>
      %64 = vector.extract_strided_slice %4 {offsets = [0, 2], sizes = [16, 1], strides = [1, 1]} : vector<16x8xf32> to vector<16x1xf32>
      %65 = vector.broadcast %64 : vector<16x1xf32> to vector<16x64xf32>
      %66 = arith.mulf %65, %62 : vector<16x64xf32>
      %67 = arith.addf %63, %66 : vector<16x64xf32>
      %c0_36 = arith.constant 0 : index
      %c0_37 = arith.constant 0 : index
      %68 = vector.load %arg7[%c0_36, %c0_37] : memref<16x64xf32, #tpu.memory_space<vmem>>, vector<16x64xf32>
      tpu.vector_store %arg7[%c0_36, %c0_37], %67 {strides = array<i32>} : memref<16x64xf32, #tpu.memory_space<vmem>>, vector<16x64xf32>,
    } else {
    }
    %20 = arith.index_cast %arg0 : i32 to index
    %c3 = arith.constant 3 : index
    %21 = memref.load %arg1[%20, %c3] : memref<1x8xi32, #tpu.memory_space<smem>>
    %c0_i32_11 = arith.constant 0 : i32
    %22 = arith.cmpi sgt, %21, %c0_i32_11 : i32
    %23 = arith.extui %22 : i1 to i32
    %c0_i32_12 = arith.constant 0 : i32
    %24 = arith.cmpi ne, %23, %c0_i32_12 : i32
    scf.if %24 {
      %c3_25 = arith.constant 3 : index
      %c0_26 = arith.constant 0 : index
      %c0_27 = arith.constant 0 : index
      %47 = vector.load %arg3[%c3_25, %c0_26, %c0_27] : memref<8x64x256xbf16, #tpu.memory_space<vmem>>, vector<1x64x256xbf16>
      %48 = vector.shape_cast %47 : vector<1x64x256xbf16> to vector<64x256xbf16>
      %cst_28 = arith.constant dense<0.000000e+00> : vector<16x256xf32>
      %49 = tpu.matmul %3, %48, %cst_28 {dimension_numbers = #tpu.dot_dimension_numbers<[1], [0], [0], [1], [0, 0, 1, 1], [], []>} : vector<16x64xbf16>, vector<64x256xbf16>, vector<16x256xf32> -> vector<16x256xf32>
      %50 = vector.extract_strided_slice %49 {offsets = [0, 0], sizes = [16, 128], strides = [1, 1]} : vector<16x256xf32> to vector<16x128xf32>
      %51 = vector.extract_strided_slice %49 {offsets = [0, 128], sizes = [16, 128], strides = [1, 1]} : vector<16x256xf32> to vector<16x128xf32>
      %52 = arith.negf %50 : vector<16x128xf32>
      %53 = math.exp %52 : vector<16x128xf32>
      %cst_29 = arith.constant 1.000000e+00 : f32
      %54 = vector.broadcast %cst_29 : f32 to vector<16x128xf32>
      %55 = arith.addf %54, %53 : vector<16x128xf32>
      %56 = arith.divf %54, %55 : vector<16x128xf32>
      %57 = arith.mulf %50, %56 : vector<16x128xf32>
      %58 = arith.mulf %57, %51 : vector<16x128xf32>
      %59 = arith.truncf %58 : vector<16x128xf32> to vector<16x128xbf16>
      %c3_30 = arith.constant 3 : index
      %c0_31 = arith.constant 0 : index
      %c0_32 = arith.constant 0 : index
      %60 = vector.load %arg4[%c3_30, %c0_31, %c0_32] : memref<8x128x64xbf16, #tpu.memory_space<vmem>>, vector<1x128x64xbf16>
      %61 = vector.shape_cast %60 : vector<1x128x64xbf16> to vector<128x64xbf16>
      %cst_33 = arith.constant dense<0.000000e+00> : vector<16x64xf32>
      %62 = tpu.matmul %59, %61, %cst_33 {dimension_numbers = #tpu.dot_dimension_numbers<[1], [0], [0], [1], [0, 0, 1, 1], [], []>} : vector<16x128xbf16>, vector<128x64xbf16>, vector<16x64xf32> -> vector<16x64xf32>
      %c0_34 = arith.constant 0 : index
      %c0_35 = arith.constant 0 : index
      %63 = vector.load %arg7[%c0_34, %c0_35] : memref<16x64xf32, #tpu.memory_space<vmem>>, vector<16x64xf32>
      %64 = vector.extract_strided_slice %4 {offsets = [0, 3], sizes = [16, 1], strides = [1, 1]} : vector<16x8xf32> to vector<16x1xf32>
      %65 = vector.broadcast %64 : vector<16x1xf32> to vector<16x64xf32>
      %66 = arith.mulf %65, %62 : vector<16x64xf32>
      %67 = arith.addf %63, %66 : vector<16x64xf32>
      %c0_36 = arith.constant 0 : index
      %c0_37 = arith.constant 0 : index
      %68 = vector.load %arg7[%c0_36, %c0_37] : memref<16x64xf32, #tpu.memory_space<vmem>>, vector<16x64xf32>
      tpu.vector_store %arg7[%c0_36, %c0_37], %67 {strides = array<i32>} : memref<16x64xf32, #tpu.memory_space<vmem>>, vector<16x64xf32>,
    } else {
    }
    %25 = arith.index_cast %arg0 : i32 to index
    %c4 = arith.constant 4 : index
    %26 = memref.load %arg1[%25, %c4] : memref<1x8xi32, #tpu.memory_space<smem>>
    %c0_i32_13 = arith.constant 0 : i32
    %27 = arith.cmpi sgt, %26, %c0_i32_13 : i32
    %28 = arith.extui %27 : i1 to i32
    %c0_i32_14 = arith.constant 0 : i32
    %29 = arith.cmpi ne, %28, %c0_i32_14 : i32
    scf.if %29 {
      %c4_25 = arith.constant 4 : index
      %c0_26 = arith.constant 0 : index
      %c0_27 = arith.constant 0 : index
      %47 = vector.load %arg3[%c4_25, %c0_26, %c0_27] : memref<8x64x256xbf16, #tpu.memory_space<vmem>>, vector<1x64x256xbf16>
      %48 = vector.shape_cast %47 : vector<1x64x256xbf16> to vector<64x256xbf16>
      %cst_28 = arith.constant dense<0.000000e+00> : vector<16x256xf32>
      %49 = tpu.matmul %3, %48, %cst_28 {dimension_numbers = #tpu.dot_dimension_numbers<[1], [0], [0], [1], [0, 0, 1, 1], [], []>} : vector<16x64xbf16>, vector<64x256xbf16>, vector<16x256xf32> -> vector<16x256xf32>
      %50 = vector.extract_strided_slice %49 {offsets = [0, 0], sizes = [16, 128], strides = [1, 1]} : vector<16x256xf32> to vector<16x128xf32>
      %51 = vector.extract_strided_slice %49 {offsets = [0, 128], sizes = [16, 128], strides = [1, 1]} : vector<16x256xf32> to vector<16x128xf32>
      %52 = arith.negf %50 : vector<16x128xf32>
      %53 = math.exp %52 : vector<16x128xf32>
      %cst_29 = arith.constant 1.000000e+00 : f32
      %54 = vector.broadcast %cst_29 : f32 to vector<16x128xf32>
      %55 = arith.addf %54, %53 : vector<16x128xf32>
      %56 = arith.divf %54, %55 : vector<16x128xf32>
      %57 = arith.mulf %50, %56 : vector<16x128xf32>
      %58 = arith.mulf %57, %51 : vector<16x128xf32>
      %59 = arith.truncf %58 : vector<16x128xf32> to vector<16x128xbf16>
      %c4_30 = arith.constant 4 : index
      %c0_31 = arith.constant 0 : index
      %c0_32 = arith.constant 0 : index
      %60 = vector.load %arg4[%c4_30, %c0_31, %c0_32] : memref<8x128x64xbf16, #tpu.memory_space<vmem>>, vector<1x128x64xbf16>
      %61 = vector.shape_cast %60 : vector<1x128x64xbf16> to vector<128x64xbf16>
      %cst_33 = arith.constant dense<0.000000e+00> : vector<16x64xf32>
      %62 = tpu.matmul %59, %61, %cst_33 {dimension_numbers = #tpu.dot_dimension_numbers<[1], [0], [0], [1], [0, 0, 1, 1], [], []>} : vector<16x128xbf16>, vector<128x64xbf16>, vector<16x64xf32> -> vector<16x64xf32>
      %c0_34 = arith.constant 0 : index
      %c0_35 = arith.constant 0 : index
      %63 = vector.load %arg7[%c0_34, %c0_35] : memref<16x64xf32, #tpu.memory_space<vmem>>, vector<16x64xf32>
      %64 = vector.extract_strided_slice %4 {offsets = [0, 4], sizes = [16, 1], strides = [1, 1]} : vector<16x8xf32> to vector<16x1xf32>
      %65 = vector.broadcast %64 : vector<16x1xf32> to vector<16x64xf32>
      %66 = arith.mulf %65, %62 : vector<16x64xf32>
      %67 = arith.addf %63, %66 : vector<16x64xf32>
      %c0_36 = arith.constant 0 : index
      %c0_37 = arith.constant 0 : index
      %68 = vector.load %arg7[%c0_36, %c0_37] : memref<16x64xf32, #tpu.memory_space<vmem>>, vector<16x64xf32>
      tpu.vector_store %arg7[%c0_36, %c0_37], %67 {strides = array<i32>} : memref<16x64xf32, #tpu.memory_space<vmem>>, vector<16x64xf32>,
    } else {
    }
    %30 = arith.index_cast %arg0 : i32 to index
    %c5 = arith.constant 5 : index
    %31 = memref.load %arg1[%30, %c5] : memref<1x8xi32, #tpu.memory_space<smem>>
    %c0_i32_15 = arith.constant 0 : i32
    %32 = arith.cmpi sgt, %31, %c0_i32_15 : i32
    %33 = arith.extui %32 : i1 to i32
    %c0_i32_16 = arith.constant 0 : i32
    %34 = arith.cmpi ne, %33, %c0_i32_16 : i32
    scf.if %34 {
      %c5_25 = arith.constant 5 : index
      %c0_26 = arith.constant 0 : index
      %c0_27 = arith.constant 0 : index
      %47 = vector.load %arg3[%c5_25, %c0_26, %c0_27] : memref<8x64x256xbf16, #tpu.memory_space<vmem>>, vector<1x64x256xbf16>
      %48 = vector.shape_cast %47 : vector<1x64x256xbf16> to vector<64x256xbf16>
      %cst_28 = arith.constant dense<0.000000e+00> : vector<16x256xf32>
      %49 = tpu.matmul %3, %48, %cst_28 {dimension_numbers = #tpu.dot_dimension_numbers<[1], [0], [0], [1], [0, 0, 1, 1], [], []>} : vector<16x64xbf16>, vector<64x256xbf16>, vector<16x256xf32> -> vector<16x256xf32>
      %50 = vector.extract_strided_slice %49 {offsets = [0, 0], sizes = [16, 128], strides = [1, 1]} : vector<16x256xf32> to vector<16x128xf32>
      %51 = vector.extract_strided_slice %49 {offsets = [0, 128], sizes = [16, 128], strides = [1, 1]} : vector<16x256xf32> to vector<16x128xf32>
      %52 = arith.negf %50 : vector<16x128xf32>
      %53 = math.exp %52 : vector<16x128xf32>
      %cst_29 = arith.constant 1.000000e+00 : f32
      %54 = vector.broadcast %cst_29 : f32 to vector<16x128xf32>
      %55 = arith.addf %54, %53 : vector<16x128xf32>
      %56 = arith.divf %54, %55 : vector<16x128xf32>
      %57 = arith.mulf %50, %56 : vector<16x128xf32>
      %58 = arith.mulf %57, %51 : vector<16x128xf32>
      %59 = arith.truncf %58 : vector<16x128xf32> to vector<16x128xbf16>
      %c5_30 = arith.constant 5 : index
      %c0_31 = arith.constant 0 : index
      %c0_32 = arith.constant 0 : index
      %60 = vector.load %arg4[%c5_30, %c0_31, %c0_32] : memref<8x128x64xbf16, #tpu.memory_space<vmem>>, vector<1x128x64xbf16>
      %61 = vector.shape_cast %60 : vector<1x128x64xbf16> to vector<128x64xbf16>
      %cst_33 = arith.constant dense<0.000000e+00> : vector<16x64xf32>
      %62 = tpu.matmul %59, %61, %cst_33 {dimension_numbers = #tpu.dot_dimension_numbers<[1], [0], [0], [1], [0, 0, 1, 1], [], []>} : vector<16x128xbf16>, vector<128x64xbf16>, vector<16x64xf32> -> vector<16x64xf32>
      %c0_34 = arith.constant 0 : index
      %c0_35 = arith.constant 0 : index
      %63 = vector.load %arg7[%c0_34, %c0_35] : memref<16x64xf32, #tpu.memory_space<vmem>>, vector<16x64xf32>
      %64 = vector.extract_strided_slice %4 {offsets = [0, 5], sizes = [16, 1], strides = [1, 1]} : vector<16x8xf32> to vector<16x1xf32>
      %65 = vector.broadcast %64 : vector<16x1xf32> to vector<16x64xf32>
      %66 = arith.mulf %65, %62 : vector<16x64xf32>
      %67 = arith.addf %63, %66 : vector<16x64xf32>
      %c0_36 = arith.constant 0 : index
      %c0_37 = arith.constant 0 : index
      %68 = vector.load %arg7[%c0_36, %c0_37] : memref<16x64xf32, #tpu.memory_space<vmem>>, vector<16x64xf32>
      tpu.vector_store %arg7[%c0_36, %c0_37], %67 {strides = array<i32>} : memref<16x64xf32, #tpu.memory_space<vmem>>, vector<16x64xf32>,
    } else {
    }
    %35 = arith.index_cast %arg0 : i32 to index
    %c6 = arith.constant 6 : index
    %36 = memref.load %arg1[%35, %c6] : memref<1x8xi32, #tpu.memory_space<smem>>
    %c0_i32_17 = arith.constant 0 : i32
    %37 = arith.cmpi sgt, %36, %c0_i32_17 : i32
    %38 = arith.extui %37 : i1 to i32
    %c0_i32_18 = arith.constant 0 : i32
    %39 = arith.cmpi ne, %38, %c0_i32_18 : i32
    scf.if %39 {
      %c6_25 = arith.constant 6 : index
      %c0_26 = arith.constant 0 : index
      %c0_27 = arith.constant 0 : index
      %47 = vector.load %arg3[%c6_25, %c0_26, %c0_27] : memref<8x64x256xbf16, #tpu.memory_space<vmem>>, vector<1x64x256xbf16>
      %48 = vector.shape_cast %47 : vector<1x64x256xbf16> to vector<64x256xbf16>
      %cst_28 = arith.constant dense<0.000000e+00> : vector<16x256xf32>
      %49 = tpu.matmul %3, %48, %cst_28 {dimension_numbers = #tpu.dot_dimension_numbers<[1], [0], [0], [1], [0, 0, 1, 1], [], []>} : vector<16x64xbf16>, vector<64x256xbf16>, vector<16x256xf32> -> vector<16x256xf32>
      %50 = vector.extract_strided_slice %49 {offsets = [0, 0], sizes = [16, 128], strides = [1, 1]} : vector<16x256xf32> to vector<16x128xf32>
      %51 = vector.extract_strided_slice %49 {offsets = [0, 128], sizes = [16, 128], strides = [1, 1]} : vector<16x256xf32> to vector<16x128xf32>
      %52 = arith.negf %50 : vector<16x128xf32>
      %53 = math.exp %52 : vector<16x128xf32>
      %cst_29 = arith.constant 1.000000e+00 : f32
      %54 = vector.broadcast %cst_29 : f32 to vector<16x128xf32>
      %55 = arith.addf %54, %53 : vector<16x128xf32>
      %56 = arith.divf %54, %55 : vector<16x128xf32>
      %57 = arith.mulf %50, %56 : vector<16x128xf32>
      %58 = arith.mulf %57, %51 : vector<16x128xf32>
      %59 = arith.truncf %58 : vector<16x128xf32> to vector<16x128xbf16>
      %c6_30 = arith.constant 6 : index
      %c0_31 = arith.constant 0 : index
      %c0_32 = arith.constant 0 : index
      %60 = vector.load %arg4[%c6_30, %c0_31, %c0_32] : memref<8x128x64xbf16, #tpu.memory_space<vmem>>, vector<1x128x64xbf16>
      %61 = vector.shape_cast %60 : vector<1x128x64xbf16> to vector<128x64xbf16>
      %cst_33 = arith.constant dense<0.000000e+00> : vector<16x64xf32>
      %62 = tpu.matmul %59, %61, %cst_33 {dimension_numbers = #tpu.dot_dimension_numbers<[1], [0], [0], [1], [0, 0, 1, 1], [], []>} : vector<16x128xbf16>, vector<128x64xbf16>, vector<16x64xf32> -> vector<16x64xf32>
      %c0_34 = arith.constant 0 : index
      %c0_35 = arith.constant 0 : index
      %63 = vector.load %arg7[%c0_34, %c0_35] : memref<16x64xf32, #tpu.memory_space<vmem>>, vector<16x64xf32>
      %64 = vector.extract_strided_slice %4 {offsets = [0, 6], sizes = [16, 1], strides = [1, 1]} : vector<16x8xf32> to vector<16x1xf32>
      %65 = vector.broadcast %64 : vector<16x1xf32> to vector<16x64xf32>
      %66 = arith.mulf %65, %62 : vector<16x64xf32>
      %67 = arith.addf %63, %66 : vector<16x64xf32>
      %c0_36 = arith.constant 0 : index
      %c0_37 = arith.constant 0 : index
      %68 = vector.load %arg7[%c0_36, %c0_37] : memref<16x64xf32, #tpu.memory_space<vmem>>, vector<16x64xf32>
      tpu.vector_store %arg7[%c0_36, %c0_37], %67 {strides = array<i32>} : memref<16x64xf32, #tpu.memory_space<vmem>>, vector<16x64xf32>,
    } else {
    }
    %40 = arith.index_cast %arg0 : i32 to index
    %c7 = arith.constant 7 : index
    %41 = memref.load %arg1[%40, %c7] : memref<1x8xi32, #tpu.memory_space<smem>>
    %c0_i32_19 = arith.constant 0 : i32
    %42 = arith.cmpi sgt, %41, %c0_i32_19 : i32
    %43 = arith.extui %42 : i1 to i32
    %c0_i32_20 = arith.constant 0 : i32
    %44 = arith.cmpi ne, %43, %c0_i32_20 : i32
    scf.if %44 {
      %c7_25 = arith.constant 7 : index
      %c0_26 = arith.constant 0 : index
      %c0_27 = arith.constant 0 : index
      %47 = vector.load %arg3[%c7_25, %c0_26, %c0_27] : memref<8x64x256xbf16, #tpu.memory_space<vmem>>, vector<1x64x256xbf16>
      %48 = vector.shape_cast %47 : vector<1x64x256xbf16> to vector<64x256xbf16>
      %cst_28 = arith.constant dense<0.000000e+00> : vector<16x256xf32>
      %49 = tpu.matmul %3, %48, %cst_28 {dimension_numbers = #tpu.dot_dimension_numbers<[1], [0], [0], [1], [0, 0, 1, 1], [], []>} : vector<16x64xbf16>, vector<64x256xbf16>, vector<16x256xf32> -> vector<16x256xf32>
      %50 = vector.extract_strided_slice %49 {offsets = [0, 0], sizes = [16, 128], strides = [1, 1]} : vector<16x256xf32> to vector<16x128xf32>
      %51 = vector.extract_strided_slice %49 {offsets = [0, 128], sizes = [16, 128], strides = [1, 1]} : vector<16x256xf32> to vector<16x128xf32>
      %52 = arith.negf %50 : vector<16x128xf32>
      %53 = math.exp %52 : vector<16x128xf32>
      %cst_29 = arith.constant 1.000000e+00 : f32
      %54 = vector.broadcast %cst_29 : f32 to vector<16x128xf32>
      %55 = arith.addf %54, %53 : vector<16x128xf32>
      %56 = arith.divf %54, %55 : vector<16x128xf32>
      %57 = arith.mulf %50, %56 : vector<16x128xf32>
      %58 = arith.mulf %57, %51 : vector<16x128xf32>
      %59 = arith.truncf %58 : vector<16x128xf32> to vector<16x128xbf16>
      %c7_30 = arith.constant 7 : index
      %c0_31 = arith.constant 0 : index
      %c0_32 = arith.constant 0 : index
      %60 = vector.load %arg4[%c7_30, %c0_31, %c0_32] : memref<8x128x64xbf16, #tpu.memory_space<vmem>>, vector<1x128x64xbf16>
      %61 = vector.shape_cast %60 : vector<1x128x64xbf16> to vector<128x64xbf16>
      %cst_33 = arith.constant dense<0.000000e+00> : vector<16x64xf32>
      %62 = tpu.matmul %59, %61, %cst_33 {dimension_numbers = #tpu.dot_dimension_numbers<[1], [0], [0], [1], [0, 0, 1, 1], [], []>} : vector<16x128xbf16>, vector<128x64xbf16>, vector<16x64xf32> -> vector<16x64xf32>
      %c0_34 = arith.constant 0 : index
      %c0_35 = arith.constant 0 : index
      %63 = vector.load %arg7[%c0_34, %c0_35] : memref<16x64xf32, #tpu.memory_space<vmem>>, vector<16x64xf32>
      %64 = vector.extract_strided_slice %4 {offsets = [0, 7], sizes = [16, 1], strides = [1, 1]} : vector<16x8xf32> to vector<16x1xf32>
      %65 = vector.broadcast %64 : vector<16x1xf32> to vector<16x64xf32>
      %66 = arith.mulf %65, %62 : vector<16x64xf32>
      %67 = arith.addf %63, %66 : vector<16x64xf32>
      %c0_36 = arith.constant 0 : index
      %c0_37 = arith.constant 0 : index
      %68 = vector.load %arg7[%c0_36, %c0_37] : memref<16x64xf32, #tpu.memory_space<vmem>>, vector<16x64xf32>
      tpu.vector_store %arg7[%c0_36, %c0_37], %67 {strides = array<i32>} : memref<16x64xf32, #tpu.memory_space<vmem>>, vector<16x64xf32>,
    } else {
    }
    %c0_21 = arith.constant 0 : index
    %c0_22 = arith.constant 0 : index
    %45 = vector.load %arg7[%c0_21, %c0_22] : memref<16x64xf32, #tpu.memory_space<vmem>>, vector<16x64xf32>
    %c0_23 = arith.constant 0 : index
    %c0_24 = arith.constant 0 : index
    %46 = vector.load %arg6[%c0_23, %c0_24] : memref<16x64xf32, #tpu.memory_space<vmem>>, vector<16x64xf32>
    tpu.vector_store %arg6[%c0_23, %c0_24], %45 {strides = array<i32>} : memref<16x64xf32, #tpu.memory_space<vmem>>, vector<16x64xf32>,
    return
  }
  func.func @transform_0(%arg0: i32, %arg1: memref<1x8xi32, #tpu.memory_space<smem>>) -> (i32, i32) {
    %c0_i32 = arith.constant 0 : i32
    %c0_i32_0 = arith.constant 0 : i32
    return %arg0, %c0_i32 : i32, i32
  }
  func.func @transform_1(%arg0: i32, %arg1: memref<1x8xi32, #tpu.memory_space<smem>>) -> (i32, i32, i32) {
    %c0_i32 = arith.constant 0 : i32
    %c0_i32_0 = arith.constant 0 : i32
    %c0_i32_1 = arith.constant 0 : i32
    %c0_i32_2 = arith.constant 0 : i32
    return %c0_i32, %c0_i32_0, %c0_i32_1 : i32, i32, i32
  }
  func.func @transform_2(%arg0: i32, %arg1: memref<1x8xi32, #tpu.memory_space<smem>>) -> (i32, i32, i32) {
    %c0_i32 = arith.constant 0 : i32
    %c0_i32_0 = arith.constant 0 : i32
    %c0_i32_1 = arith.constant 0 : i32
    %c0_i32_2 = arith.constant 0 : i32
    return %c0_i32, %c0_i32_0, %c0_i32_1 : i32, i32, i32
  }
  func.func @transform_3(%arg0: i32, %arg1: memref<1x8xi32, #tpu.memory_space<smem>>) -> (i32, i32) {
    %c0_i32 = arith.constant 0 : i32
    %c0_i32_0 = arith.constant 0 : i32
    return %arg0, %c0_i32 : i32, i32
  }
  func.func @transform_4(%arg0: i32, %arg1: memref<1x8xi32, #tpu.memory_space<smem>>) -> (i32, i32) {
    %c0_i32 = arith.constant 0 : i32
    %c0_i32_0 = arith.constant 0 : i32
    return %arg0, %c0_i32 : i32, i32
  }
}

</mosaic_0001>

<bundles_post_ra>
// kernel: tpu_custom_call.1
= control target key start
LH: loop header
LB: loop body
LE: loop exit
PB: predicated region body
PF: predicated region fallthrough
CT: control target
= control target key end

     0   :  { %s2844_s21 = smov [#allocation4]   ;;  %s3555_s0 = inlined_call_operand.vmem [shape: s32[1,8], index: 0, kind: input, shape index: {}]   ;;  %s3556_s1 = inlined_call_operand.vmem [shape: f32[16,64], index: 1, kind: input, shape index: {}]   ;;  %s3557_s2 = inlined_call_operand.vmem [shape: bf16[8,64,256], index: 2, kind: input, shape index: {}]   ;;  %s3558_s3 = inlined_call_operand.vmem [shape: bf16[8,128,64], index: 3, kind: input, shape index: {}]   ;;  %s3559_s4 = inlined_call_operand.vmem [shape: f32[16,8], index: 4, kind: input, shape index: {}]   ;;  %s3560_s5 = inlined_call_operand.hbm [shape: f32[16,64], index: 5, kind: output, shape index: {}]  }
   0x1   :  { %s11_s20 = sshll.u32 %s3555_s0, 4  ;;  %s12_s20 = int_to_ptr.vmem [resolvable:$true] %s11_s20 }
   0x2   :  { %14 = dma.vmem_to_smem %s12_s20, 16, %s2844_s21, [#allocation3] }
   0x3   :  { %2840 = dma.done.wait [#allocation3], 16 }
   0x4   :  { %2841 = vsyncadd [#allocation3], 4294967280 }
   0x5   :  { %17 = sfence }
   0x6   :  { %18 = vsyncpa [#allocation6], 0  ;;  %vm28_vm0 = vcmask 523264   ;;  %v31_v0 = vld [vmem:[%s3556_s1] sm:$0xff]  ;;  %v32_v1 = vld [vmem:[%s3556_s1 + $0x8] sm:$0xff]  ;;  %v2845_v2 = vmov 0.0  }
   0x7   :  { %29 = vst.msk [vmem:[#allocation2] sm:$0xff] %vm28_vm0, %v2845_v2  ;;  %v2897_v3 = vpack.c.bf16 %v32_v1, %v31_v0  ;;  %v2902_v4 = vld [vmem:[%s3559_s4] sm:$0xff]  ;;  %v2907_v5 = vld [vmem:[%s3559_s4 + $0x8] sm:$0xff]  ;;  %s37_s29 = sld [smem:[#allocation4]] }
   0x8   :  { %30 = vst.msk [vmem:[#allocation2 + $0x8] sm:$0xff] %vm28_vm0, %v2845_v2 }
   0xd   :  { %p1864_p0 = scmp.le.s32.totalorder %s37_s29, 0 }
   0xf   :  { %41 = sbr.rel (%p1864_p0) target bundleno = 351 (0x15f), region = 21 }
  0x14   :  { %v1891_v6 = vld [vmem:[%s3557_s2 + $0x30] sm:$0xf]  ;;  %v2598_v7 = vld [vmem:[%s3557_s2 + $0x34] sm:$0xf0]  ;;  %v1883_v8 = vld [vmem:[%s3557_s2 + $0x20] sm:$0xf] }
  0x15   :  { %v1892_v9 = vor.u32 %v2598_v7, %v1891_v6  ;;  %v2596_v10 = vld [vmem:[%s3557_s2 + $0x24] sm:$0xf0]  ;;  %v2597_v11 = vld [vmem:[%s3557_s2 + $0x34] sm:$0xf]  ;;  %v1893_v13 = vld [vmem:[%s3557_s2 + $0x38] sm:$0xf0] }
  0x16   :  { %v1884_v12 = vor.u32 %v2596_v10, %v1883_v8  ;;  %v2595_v14 = vld [vmem:[%s3557_s2 + $0x24] sm:$0xf]  ;;  %v1885_v15 = vld [vmem:[%s3557_s2 + $0x28] sm:$0xf0]  ;;  %v1875_v16 = vld [vmem:[%s3557_s2 + $0x10] sm:$0xf]  ;;  %v1896_v18 = vor.u32 %v2597_v11, %v1893_v13 }
  0x17   :  { %97 = vmatpush.bf16.msra.mxu0 %v1892_v9  ;;  %v2594_v17 = vld [vmem:[%s3557_s2 + $0x14] sm:$0xf0]  ;;  %v1888_v19 = vor.u32 %v2595_v14, %v1885_v15  ;;  %v2593_v21 = vld [vmem:[%s3557_s2 + $0x14] sm:$0xf]  ;;  %v1877_v22 = vld [vmem:[%s3557_s2 + $0x18] sm:$0xf0] }
  0x18   :  { %111 = vmatpush.bf16.msra.mxu1 %v1896_v18  ;;  %v1876_v20 = vor.u32 %v2594_v17, %v1875_v16  ;;  %v1867_v23 = vld [vmem:[%s3557_s2] sm:$0xf]  ;;  %v2592_v24 = vld [vmem:[%s3557_s2 + $0x4] sm:$0xf0]  ;;  %v1880_v25 = vor.u32 %v2593_v21, %v1877_v22  ;;  %v2591_v27 = vld [vmem:[%s3557_s2 + $0x4] sm:$0xf] }
  0x19   :  { %v1868_v26 = vor.u32 %v2592_v24, %v1867_v23  ;;  %v1869_v28 = vld [vmem:[%s3557_s2 + $0x8] sm:$0xf0]  ;;  %v2606_v30 = vld [vmem:[%s3558_s3 + $0x38] sm:$0xff]  ;;  %v2605_v31 = vld [vmem:[%s3558_s3 + $0x30] sm:$0xff]  ;;  %v2846_v44 = vmov 0  }
  0x1a   :  { %v1872_v29 = vor.u32 %v2591_v27, %v1869_v28  ;;  %228 = vmatpush.bf16.msra.mxu2 %v2606_v30  ;;  %v2604_v32 = vld [vmem:[%s3558_s3 + $0x28] sm:$0xff]  ;;  %v2603_v33 = vld [vmem:[%s3558_s3 + $0x20] sm:$0xff]  ;;  %v2602_v34 = vld [vmem:[%s3558_s3 + $0x18] sm:$0xff]  ;;  %2732 = vset.pattern.permute.xlu0 %v2846_v44 }
  0x1b   :  { %98 = vmatpush.bf16.msra.mxu0 %v1884_v12  ;;  %v2601_v35 = vld [vmem:[%s3558_s3 + $0x10] sm:$0xff]  ;;  %v2600_v38 = vld [vmem:[%s3558_s3 + $0x8] sm:$0xff]  ;;  %v2599_v39 = vld [vmem:[%s3558_s3] sm:$0xff]  ;;  %246 = vperm.xlu0 %2732, %v2902_v4  }
  0x1c   :  { %112 = vmatpush.bf16.msra.mxu1 %v1888_v19  ;;  %v242_v15 = vld [vmem:[#allocation2] sm:$0xff] }
  0x1e   :  { %229 = vmatpush.bf16.msra.mxu2 %v2605_v31 }
  0x1f   :  { %99 = vmatpush.bf16.msra.mxu0 %v1876_v20  ;;  %v243_v20 = vld [vmem:[#allocation2 + $0x8] sm:$0xff] }
  0x20   :  { %113 = vmatpush.bf16.msra.mxu1 %v1880_v25 }
  0x22   :  { %230 = vmatpush.bf16.msra.mxu2 %v2604_v32 }
  0x23   :  { %100 = vmatpush.bf16.msra.mxu0 %v1868_v26  ;;  %251 = vperm.xlu0 %2732, %v2907_v5  }
  0x24   :  { %114 = vmatpush.bf16.msra.mxu1 %v1872_v29 }
  0x26   :  { %1897 = vmatmul.msk.bf16.vlgmr.msra.gmra.mxu0 %vm28_vm0, %v2897_v3  ;;  %231 = vmatpush.bf16.msra.mxu2 %v2603_v33 }
  0x27   :  { %1898 = vmatmul.msk.bf16.vlgmr.msra.gmra.mxu1 %vm28_vm0, %v2897_v3 }
  0x2a   :  { %232 = vmatpush.bf16.msra.mxu2 %v2602_v34 }
  0x2e   :  { %233 = vmatpush.bf16.msra.mxu2 %v2601_v35 }
  0x32   :  { %234 = vmatpush.bf16.msra.mxu2 %v2600_v38 }
  0x36   :  { %235 = vmatpush.bf16.msra.mxu2 %v2599_v39 }
  0x8d   :  { %v247_v13 = vpop.permute.xlu0 %246 }
  0x95   :  { %v252_v18 = vpop.permute.xlu0 %251 }
  0xa3   :  { %v102_v36 = vpop.f32.mrf.mxu0 }
  0xa4   :  { %v1899_v37 = vmul.f32 -1.442695, %v102_v36  ;;  %v116_v56 = vpop.f32.mrf.mxu1 }
  0xa6   :  { %2733 = vpow2.f32 %v1899_v37 }
  0xab   :  { %v104_v40 = vpop.f32.mrf.mxu0 }
  0xac   :  { %v2734_v41 = vpop.eup %2733  ;;  %v1900_v42 = vmul.f32 -1.442695, %v104_v40  ;;  %v118_v9 = vpop.f32.mrf.mxu1 }
  0xad   :  { %v127_v43 = vadd.f32 1.0, %v2734_v41 }
  0xae   :  { %2735 = vpow2.f32 %v1900_v42 }
  0xaf   :  { %2737 = vrcp.f32 %v127_v43  ;;  %v140_v53 = vand.u32 2147483648, %v127_v43  ;;  %vm134_vm2 = vweird.f32 %v127_v43  ;;  %v138_v54 = vand.u32 2147483647, %v127_v43 }
  0xb1   :  { %v141_v59 = vor.u32 1.1754944e-38, %v140_v53  ;;  %vm139_vm4 = vcmp.eq.f32.partialorder %v138_v54, 8.507059e+37 }
  0xb4   :  { %v2736_v45 = vpop.eup %2735 }
  0xb5   :  { %v2738_v46 = vpop.eup %2737  ;;  %v128_v47 = vadd.f32 1.0, %v2736_v45 }
  0xb6   :  { %v130_v48 = vmul.f32 %v2738_v46, %v127_v43  ;;  %vm135_vm1 = vweird.f32 %v2738_v46 }
  0xb7   :  { %2739 = vrcp.f32 %v128_v47  ;;  %vm136_vm3 = vmor %vm134_vm2, %vm135_vm1  ;;  %v155_v60 = vand.u32 2147483648, %v128_v47  ;;  %v153_v62 = vand.u32 2147483647, %v128_v47  ;;  %vm149_vm6 = vweird.f32 %v128_v47 }
  0xb8   :  { %v131_v49 = vsub.f32 1.0, %v130_v48 }
  0xb9   :  { %v156_v1 = vor.u32 1.1754944e-38, %v155_v60  ;;  %vm154_vm8 = vcmp.eq.f32.partialorder %v153_v62, 8.507059e+37 }
  0xba   :  { %v132_v50 = vmul.f32 %v2738_v46, %v131_v49 }
  0xbc   :  { %v133_v51 = vadd.f32 %v2738_v46, %v132_v50 }
  0xbd   :  { %v2740_v52 = vpop.eup %2739 }
  0xbe   :  { %v145_v55 = vmul.f32 %v2740_v52, %v128_v47  ;;  %v137_v57 = vsel %vm136_vm3, %v2738_v46, %v133_v51  ;;  %vm150_vm5 = vweird.f32 %v2740_v52 }
  0xbf   :  { %v142_v63 = vsel %vm139_vm4, %v141_v59, %v137_v57  ;;  %vm151_vm7 = vmor %vm149_vm6, %vm150_vm5 }
  0xc0   :  { %v146_v58 = vsub.f32 1.0, %v145_v55  ;;  %v159_v2 = vmul.f32 %v142_v63, %v102_v36 }
  0xc2   :  { %v147_v61 = vmul.f32 %v2740_v52, %v146_v58  ;;  %v161_v10 = vmul.f32 %v159_v2, %v116_v56 }
  0xc4   :  { %v148_v0 = vadd.f32 %v2740_v52, %v147_v61 }
  0xc6   :  { %v152_v6 = vsel %vm151_vm7, %v2740_v52, %v148_v0 }
  0xc7   :  { %v157_v7 = vsel %vm154_vm8, %v156_v1, %v152_v6 }
  0xc8   :  { %v160_v8 = vmul.f32 %v157_v7, %v104_v40 }
  0xca   :  { %v162_v11 = vmul.f32 %v160_v8, %v118_v9 }
  0xcc   :  { %v163_v12 = vpack.c.bf16 %v162_v11, %v161_v10 }
  0xce   :  { %236 = vmatmul.bf16.vlgmr.msra.gmra.mxu2 %v163_v12 }
 0x151   :  { %v237_v14 = vpop.f32.mrf.mxu2 }
 0x152   :  { %v254_v16 = vmul.f32 %v247_v13, %v237_v14 }
 0x154   :  { %v256_v17 = vadd.f32 %v254_v16, %v242_v15 }
 0x156   :  { %258 = vst.msk [vmem:[#allocation2] sm:$0xff] %vm28_vm0, %v256_v17 }
 0x159   :  { %v239_v19 = vpop.f32.mrf.mxu2 }
 0x15a   :  { %v255_v21 = vmul.f32 %v252_v18, %v239_v19 }
 0x15c   :  { %v257_v22 = vadd.f32 %v255_v21, %v243_v20 }
 0x15e   :  { %259 = vst.msk [vmem:[#allocation2 + $0x8] sm:$0xff] %vm28_vm0, %v257_v22 }
 0x15f PF:  { %s1933_s23 = sld [smem:[#allocation4 + $0x1]] }
 0x165   :  { %p1934_p1 = scmp.le.s32.totalorder %s1933_s23, 0 }
 0x167   :  { %265 = sbr.rel (%p1934_p1) target bundleno = 695 (0x2b7), region = 25 }
 0x16c   :  { %v1969_v23 = vld [vmem:[%s3557_s2 + $0x70] sm:$0xf]  ;;  %v2614_v24 = vld [vmem:[%s3557_s2 + $0x74] sm:$0xf0]  ;;  %v1961_v25 = vld [vmem:[%s3557_s2 + $0x60] sm:$0xf] }
 0x16d   :  { %v1970_v26 = vor.u32 %v2614_v24, %v1969_v23  ;;  %v2612_v27 = vld [vmem:[%s3557_s2 + $0x64] sm:$0xf0]  ;;  %v2613_v28 = vld [vmem:[%s3557_s2 + $0x74] sm:$0xf]  ;;  %v1971_v30 = vld [vmem:[%s3557_s2 + $0x78] sm:$0xf0] }
 0x16e   :  { %v1962_v29 = vor.u32 %v2612_v27, %v1961_v25  ;;  %v2611_v31 = vld [vmem:[%s3557_s2 + $0x64] sm:$0xf]  ;;  %v1963_v32 = vld [vmem:[%s3557_s2 + $0x68] sm:$0xf0]  ;;  %v1953_v33 = vld [vmem:[%s3557_s2 + $0x50] sm:$0xf]  ;;  %v1974_v35 = vor.u32 %v2613_v28, %v1971_v30 }
 0x16f   :  { %322 = vmatpush.bf16.msra.mxu0 %v1970_v26  ;;  %v2610_v34 = vld [vmem:[%s3557_s2 + $0x54] sm:$0xf0]  ;;  %v1966_v36 = vor.u32 %v2611_v31, %v1963_v32  ;;  %v2609_v38 = vld [vmem:[%s3557_s2 + $0x54] sm:$0xf]  ;;  %v1955_v39 = vld [vmem:[%s3557_s2 + $0x58] sm:$0xf0] }
 0x170   :  { %336 = vmatpush.bf16.msra.mxu1 %v1974_v35  ;;  %v1954_v37 = vor.u32 %v2610_v34, %v1953_v33  ;;  %v1945_v40 = vld [vmem:[%s3557_s2 + $0x40] sm:$0xf]  ;;  %v2608_v41 = vld [vmem:[%s3557_s2 + $0x44] sm:$0xf0]  ;;  %v1958_v42 = vor.u32 %v2609_v38, %v1955_v39  ;;  %v2607_v44 = vld [vmem:[%s3557_s2 + $0x44] sm:$0xf] }
 0x171   :  { %v1946_v43 = vor.u32 %v2608_v41, %v1945_v40  ;;  %v1947_v45 = vld [vmem:[%s3557_s2 + $0x48] sm:$0xf0]  ;;  %v2622_v47 = vld [vmem:[%s3558_s3 + $0x78] sm:$0xff]  ;;  %v2621_v48 = vld [vmem:[%s3558_s3 + $0x70] sm:$0xff]  ;;  %v2847_v61 = vmov 1  }
 0x172   :  { %v1950_v46 = vor.u32 %v2607_v44, %v1947_v45  ;;  %454 = vmatpush.bf16.msra.mxu2 %v2622_v47  ;;  %v2620_v49 = vld [vmem:[%s3558_s3 + $0x68] sm:$0xff]  ;;  %v2619_v50 = vld [vmem:[%s3558_s3 + $0x60] sm:$0xff]  ;;  %v2618_v51 = vld [vmem:[%s3558_s3 + $0x58] sm:$0xff]  ;;  %2741 = vset.pattern.permute.xlu0 %v2847_v61 }
 0x173   :  { %323 = vmatpush.bf16.msra.mxu0 %v1962_v29  ;;  %v2617_v52 = vld [vmem:[%s3558_s3 + $0x50] sm:$0xff]  ;;  %v2616_v55 = vld [vmem:[%s3558_s3 + $0x48] sm:$0xff]  ;;  %v2615_v56 = vld [vmem:[%s3558_s3 + $0x40] sm:$0xff]  ;;  %472 = vperm.xlu0 %2741, %v2902_v4  }
 0x174   :  { %337 = vmatpush.bf16.msra.mxu1 %v1966_v36  ;;  %v468_v32 = vld [vmem:[#allocation2] sm:$0xff] }
 0x176   :  { %455 = vmatpush.bf16.msra.mxu2 %v2621_v48 }
 0x177   :  { %324 = vmatpush.bf16.msra.mxu0 %v1954_v37  ;;  %v469_v37 = vld [vmem:[#allocation2 + $0x8] sm:$0xff] }
 0x178   :  { %338 = vmatpush.bf16.msra.mxu1 %v1958_v42 }
 0x17a   :  { %456 = vmatpush.bf16.msra.mxu2 %v2620_v49 }
 0x17b   :  { %325 = vmatpush.bf16.msra.mxu0 %v1946_v43  ;;  %477 = vperm.xlu0 %2741, %v2907_v5  }
 0x17c   :  { %339 = vmatpush.bf16.msra.mxu1 %v1950_v46 }
 0x17e   :  { %1975 = vmatmul.msk.bf16.vlgmr.msra.gmra.mxu0 %vm28_vm0, %v2897_v3  ;;  %457 = vmatpush.bf16.msra.mxu2 %v2619_v50 }
 0x17f   :  { %1976 = vmatmul.msk.bf16.vlgmr.msra.gmra.mxu1 %vm28_vm0, %v2897_v3 }
 0x182   :  { %458 = vmatpush.bf16.msra.mxu2 %v2618_v51 }
 0x186   :  { %459 = vmatpush.bf16.msra.mxu2 %v2617_v52 }
 0x18a   :  { %460 = vmatpush.bf16.msra.mxu2 %v2616_v55 }
 0x18e   :  { %461 = vmatpush.bf16.msra.mxu2 %v2615_v56 }
 0x1e5   :  { %v473_v30 = vpop.permute.xlu0 %472 }
 0x1ed   :  { %v478_v35 = vpop.permute.xlu0 %477 }
 0x1fb   :  { %v327_v53 = vpop.f32.mrf.mxu0 }
 0x1fc   :  { %v1977_v54 = vmul.f32 -1.442695, %v327_v53  ;;  %v341_v12 = vpop.f32.mrf.mxu1 }
 0x1fe   :  { %2742 = vpow2.f32 %v1977_v54 }
 0x203   :  { %v329_v57 = vpop.f32.mrf.mxu0 }
 0x204   :  { %v2743_v58 = vpop.eup %2742  ;;  %v1978_v59 = vmul.f32 -1.442695, %v329_v57  ;;  %v343_v26 = vpop.f32.mrf.mxu1 }
 0x205   :  { %v352_v60 = vadd.f32 1.0, %v2743_v58 }
 0x206   :  { %2744 = vpow2.f32 %v1978_v59 }
 0x207   :  { %2746 = vrcp.f32 %v352_v60  ;;  %v365_v9 = vand.u32 2147483648, %v352_v60  ;;  %vm359_vm10 = vweird.f32 %v352_v60  ;;  %v363_v10 = vand.u32 2147483647, %v352_v60 }
 0x209   :  { %v366_v15 = vor.u32 1.1754944e-38, %v365_v9  ;;  %vm364_vm12 = vcmp.eq.f32.partialorder %v363_v10, 8.507059e+37 }
 0x20c   :  { %v2745_v62 = vpop.eup %2744 }
 0x20d   :  { %v2747_v63 = vpop.eup %2746  ;;  %v353_v0 = vadd.f32 1.0, %v2745_v62 }
 0x20e   :  { %v355_v1 = vmul.f32 %v2747_v63, %v352_v60  ;;  %vm360_vm9 = vweird.f32 %v2747_v63 }
 0x20f   :  { %2748 = vrcp.f32 %v353_v0  ;;  %vm361_vm11 = vmor %vm359_vm10, %vm360_vm9  ;;  %v380_v16 = vand.u32 2147483648, %v353_v0  ;;  %v378_v18 = vand.u32 2147483647, %v353_v0  ;;  %vm374_vm14 = vweird.f32 %v353_v0 }
 0x210   :  { %v356_v2 = vsub.f32 1.0, %v355_v1 }
 0x211   :  { %v381_v21 = vor.u32 1.1754944e-38, %v380_v16  ;;  %vm379_vm1 = vcmp.eq.f32.partialorder %v378_v18, 8.507059e+37 }
 0x212   :  { %v357_v6 = vmul.f32 %v2747_v63, %v356_v2 }
 0x214   :  { %v358_v7 = vadd.f32 %v2747_v63, %v357_v6 }
 0x215   :  { %v2749_v8 = vpop.eup %2748 }
 0x216   :  { %v370_v11 = vmul.f32 %v2749_v8, %v353_v0  ;;  %v362_v13 = vsel %vm361_vm11, %v2747_v63, %v358_v7  ;;  %vm375_vm13 = vweird.f32 %v2749_v8 }
 0x217   :  { %v367_v19 = vsel %vm364_vm12, %v366_v15, %v362_v13  ;;  %vm376_vm15 = vmor %vm374_vm14, %vm375_vm13 }
 0x218   :  { %v371_v14 = vsub.f32 1.0, %v370_v11  ;;  %v384_v22 = vmul.f32 %v367_v19, %v327_v53 }
 0x21a   :  { %v372_v17 = vmul.f32 %v2749_v8, %v371_v14  ;;  %v386_v27 = vmul.f32 %v384_v22, %v341_v12 }
 0x21c   :  { %v373_v20 = vadd.f32 %v2749_v8, %v372_v17 }
 0x21e   :  { %v377_v23 = vsel %vm376_vm15, %v2749_v8, %v373_v20 }
 0x21f   :  { %v382_v24 = vsel %vm379_vm1, %v381_v21, %v377_v23 }
 0x220   :  { %v385_v25 = vmul.f32 %v382_v24, %v329_v57 }
 0x222   :  { %v387_v28 = vmul.f32 %v385_v25, %v343_v26 }
 0x224   :  { %v388_v29 = vpack.c.bf16 %v387_v28, %v386_v27 }
 0x226   :  { %462 = vmatmul.bf16.vlgmr.msra.gmra.mxu2 %v388_v29 }
 0x2a9   :  { %v463_v31 = vpop.f32.mrf.mxu2 }
 0x2aa   :  { %v480_v33 = vmul.f32 %v473_v30, %v463_v31 }
 0x2ac   :  { %v482_v34 = vadd.f32 %v480_v33, %v468_v32 }
 0x2ae   :  { %484 = vst.msk [vmem:[#allocation2] sm:$0xff] %vm28_vm0, %v482_v34 }
 0x2b1   :  { %v465_v36 = vpop.f32.mrf.mxu2 }
 0x2b2   :  { %v481_v38 = vmul.f32 %v478_v35, %v465_v36 }
 0x2b4   :  { %v483_v39 = vadd.f32 %v481_v38, %v469_v37 }
 0x2b6   :  { %485 = vst.msk [vmem:[#allocation2 + $0x8] sm:$0xff] %vm28_vm0, %v483_v39 }
 0x2b7 PF:  { %s2027_s16 = sld [smem:[#allocation4 + $0x2]] }
 0x2bd   :  { %p2028_p2 = scmp.le.s32.totalorder %s2027_s16, 0 }
 0x2bf   :  { %491 = sbr.rel (%p2028_p2) target bundleno = 1039 (0x40f), region = 29 }
 0x2c4   :  { %v2063_v40 = vld [vmem:[%s3557_s2 + $0xb0] sm:$0xf]  ;;  %v2630_v41 = vld [vmem:[%s3557_s2 + $0xb4] sm:$0xf0]  ;;  %v2055_v42 = vld [vmem:[%s3557_s2 + $0xa0] sm:$0xf] }
 0x2c5   :  { %v2064_v43 = vor.u32 %v2630_v41, %v2063_v40  ;;  %v2628_v44 = vld [vmem:[%s3557_s2 + $0xa4] sm:$0xf0]  ;;  %v2629_v45 = vld [vmem:[%s3557_s2 + $0xb4] sm:$0xf]  ;;  %v2065_v47 = vld [vmem:[%s3557_s2 + $0xb8] sm:$0xf0] }
 0x2c6   :  { %v2056_v46 = vor.u32 %v2628_v44, %v2055_v42  ;;  %v2627_v48 = vld [vmem:[%s3557_s2 + $0xa4] sm:$0xf]  ;;  %v2057_v49 = vld [vmem:[%s3557_s2 + $0xa8] sm:$0xf0]  ;;  %v2047_v50 = vld [vmem:[%s3557_s2 + $0x90] sm:$0xf]  ;;  %v2068_v52 = vor.u32 %v2629_v45, %v2065_v47 }
 0x2c7   :  { %548 = vmatpush.bf16.msra.mxu0 %v2064_v43  ;;  %v2626_v51 = vld [vmem:[%s3557_s2 + $0x94] sm:$0xf0]  ;;  %v2060_v53 = vor.u32 %v2627_v48, %v2057_v49  ;;  %v2625_v55 = vld [vmem:[%s3557_s2 + $0x94] sm:$0xf]  ;;  %v2049_v56 = vld [vmem:[%s3557_s2 + $0x98] sm:$0xf0] }
 0x2c8   :  { %562 = vmatpush.bf16.msra.mxu1 %v2068_v52  ;;  %v2048_v54 = vor.u32 %v2626_v51, %v2047_v50  ;;  %v2039_v57 = vld [vmem:[%s3557_s2 + $0x80] sm:$0xf]  ;;  %v2624_v58 = vld [vmem:[%s3557_s2 + $0x84] sm:$0xf0]  ;;  %v2052_v59 = vor.u32 %v2625_v55, %v2049_v56  ;;  %v2623_v61 = vld [vmem:[%s3557_s2 + $0x84] sm:$0xf] }
 0x2c9   :  { %v2040_v60 = vor.u32 %v2624_v58, %v2039_v57  ;;  %v2041_v62 = vld [vmem:[%s3557_s2 + $0x88] sm:$0xf0]  ;;  %v2638_v0 = vld [vmem:[%s3558_s3 + $0xb8] sm:$0xff]  ;;  %v2637_v1 = vld [vmem:[%s3558_s3 + $0xb0] sm:$0xff]  ;;  %v2848_v17 = vmov 2  }
 0x2ca   :  { %v2044_v63 = vor.u32 %v2623_v61, %v2041_v62  ;;  %680 = vmatpush.bf16.msra.mxu2 %v2638_v0  ;;  %v2636_v2 = vld [vmem:[%s3558_s3 + $0xa8] sm:$0xff]  ;;  %v2635_v6 = vld [vmem:[%s3558_s3 + $0xa0] sm:$0xff]  ;;  %v2634_v7 = vld [vmem:[%s3558_s3 + $0x98] sm:$0xff]  ;;  %2750 = vset.pattern.permute.xlu0 %v2848_v17 }
 0x2cb   :  { %549 = vmatpush.bf16.msra.mxu0 %v2056_v46  ;;  %v2633_v8 = vld [vmem:[%s3558_s3 + $0x90] sm:$0xff]  ;;  %v2632_v11 = vld [vmem:[%s3558_s3 + $0x88] sm:$0xff]  ;;  %v2631_v12 = vld [vmem:[%s3558_s3 + $0x80] sm:$0xff]  ;;  %698 = vperm.xlu0 %2750, %v2902_v4  }
 0x2cc   :  { %563 = vmatpush.bf16.msra.mxu1 %v2060_v53  ;;  %v694_v49 = vld [vmem:[#allocation2] sm:$0xff] }
 0x2ce   :  { %681 = vmatpush.bf16.msra.mxu2 %v2637_v1 }
 0x2cf   :  { %550 = vmatpush.bf16.msra.mxu0 %v2048_v54  ;;  %v695_v54 = vld [vmem:[#allocation2 + $0x8] sm:$0xff] }
 0x2d0   :  { %564 = vmatpush.bf16.msra.mxu1 %v2052_v59 }
 0x2d2   :  { %682 = vmatpush.bf16.msra.mxu2 %v2636_v2 }
 0x2d3   :  { %551 = vmatpush.bf16.msra.mxu0 %v2040_v60  ;;  %703 = vperm.xlu0 %2750, %v2907_v5  }
 0x2d4   :  { %565 = vmatpush.bf16.msra.mxu1 %v2044_v63 }
 0x2d6   :  { %2069 = vmatmul.msk.bf16.vlgmr.msra.gmra.mxu0 %vm28_vm0, %v2897_v3  ;;  %683 = vmatpush.bf16.msra.mxu2 %v2635_v6 }
 0x2d7   :  { %2070 = vmatmul.msk.bf16.vlgmr.msra.gmra.mxu1 %vm28_vm0, %v2897_v3 }
 0x2da   :  { %684 = vmatpush.bf16.msra.mxu2 %v2634_v7 }
 0x2de   :  { %685 = vmatpush.bf16.msra.mxu2 %v2633_v8 }
 0x2e2   :  { %686 = vmatpush.bf16.msra.mxu2 %v2632_v11 }
 0x2e6   :  { %687 = vmatpush.bf16.msra.mxu2 %v2631_v12 }
 0x33d   :  { %v699_v47 = vpop.permute.xlu0 %698 }
 0x345   :  { %v704_v52 = vpop.permute.xlu0 %703 }
 0x353   :  { %v553_v9 = vpop.f32.mrf.mxu0 }
 0x354   :  { %v2071_v10 = vmul.f32 -1.442695, %v553_v9  ;;  %v567_v29 = vpop.f32.mrf.mxu1 }
 0x356   :  { %2751 = vpow2.f32 %v2071_v10 }
 0x35b   :  { %v555_v13 = vpop.f32.mrf.mxu0 }
 0x35c   :  { %v2752_v14 = vpop.eup %2751  ;;  %v2072_v15 = vmul.f32 -1.442695, %v555_v13  ;;  %v569_v43 = vpop.f32.mrf.mxu1 }
 0x35d   :  { %v578_v16 = vadd.f32 1.0, %v2752_v14 }
 0x35e   :  { %2753 = vpow2.f32 %v2072_v15 }
 0x35f   :  { %2755 = vrcp.f32 %v578_v16  ;;  %v591_v26 = vand.u32 2147483648, %v578_v16  ;;  %vm585_vm3 = vweird.f32 %v578_v16  ;;  %v589_v27 = vand.u32 2147483647, %v578_v16 }
 0x361   :  { %v592_v32 = vor.u32 1.1754944e-38, %v591_v26  ;;  %vm590_vm5 = vcmp.eq.f32.partialorder %v589_v27, 8.507059e+37 }
 0x364   :  { %v2754_v18 = vpop.eup %2753 }
 0x365   :  { %v2756_v19 = vpop.eup %2755  ;;  %v579_v20 = vadd.f32 1.0, %v2754_v18 }
 0x366   :  { %v581_v21 = vmul.f32 %v2756_v19, %v578_v16  ;;  %vm586_vm2 = vweird.f32 %v2756_v19 }
 0x367   :  { %2757 = vrcp.f32 %v579_v20  ;;  %vm587_vm4 = vmor %vm585_vm3, %vm586_vm2  ;;  %v606_v33 = vand.u32 2147483648, %v579_v20  ;;  %v604_v35 = vand.u32 2147483647, %v579_v20  ;;  %vm600_vm7 = vweird.f32 %v579_v20 }
 0x368   :  { %v582_v22 = vsub.f32 1.0, %v581_v21 }
 0x369   :  { %v607_v38 = vor.u32 1.1754944e-38, %v606_v33  ;;  %vm605_vm9 = vcmp.eq.f32.partialorder %v604_v35, 8.507059e+37 }
 0x36a   :  { %v583_v23 = vmul.f32 %v2756_v19, %v582_v22 }
 0x36c   :  { %v584_v24 = vadd.f32 %v2756_v19, %v583_v23 }
 0x36d   :  { %v2758_v25 = vpop.eup %2757 }
 0x36e   :  { %v596_v28 = vmul.f32 %v2758_v25, %v579_v20  ;;  %v588_v30 = vsel %vm587_vm4, %v2756_v19, %v584_v24  ;;  %vm601_vm6 = vweird.f32 %v2758_v25 }
 0x36f   :  { %v593_v36 = vsel %vm590_vm5, %v592_v32, %v588_v30  ;;  %vm602_vm8 = vmor %vm600_vm7, %vm601_vm6 }
 0x370   :  { %v597_v31 = vsub.f32 1.0, %v596_v28  ;;  %v610_v39 = vmul.f32 %v593_v36, %v553_v9 }
 0x372   :  { %v598_v34 = vmul.f32 %v2758_v25, %v597_v31  ;;  %v612_v44 = vmul.f32 %v610_v39, %v567_v29 }
 0x374   :  { %v599_v37 = vadd.f32 %v2758_v25, %v598_v34 }
 0x376   :  { %v603_v40 = vsel %vm602_vm8, %v2758_v25, %v599_v37 }
 0x377   :  { %v608_v41 = vsel %vm605_vm9, %v607_v38, %v603_v40 }
 0x378   :  { %v611_v42 = vmul.f32 %v608_v41, %v555_v13 }
 0x37a   :  { %v613_v45 = vmul.f32 %v611_v42, %v569_v43 }
 0x37c   :  { %v614_v46 = vpack.c.bf16 %v613_v45, %v612_v44 }
 0x37e   :  { %688 = vmatmul.bf16.vlgmr.msra.gmra.mxu2 %v614_v46 }
 0x401   :  { %v689_v48 = vpop.f32.mrf.mxu2 }
 0x402   :  { %v706_v50 = vmul.f32 %v699_v47, %v689_v48 }
 0x404   :  { %v708_v51 = vadd.f32 %v706_v50, %v694_v49 }
 0x406   :  { %710 = vst.msk [vmem:[#allocation2] sm:$0xff] %vm28_vm0, %v708_v51 }
 0x409   :  { %v691_v53 = vpop.f32.mrf.mxu2 }
 0x40a   :  { %v707_v55 = vmul.f32 %v704_v52, %v691_v53 }
 0x40c   :  { %v709_v56 = vadd.f32 %v707_v55, %v695_v54 }
 0x40e   :  { %711 = vst.msk [vmem:[#allocation2 + $0x8] sm:$0xff] %vm28_vm0, %v709_v56 }
 0x40f PF:  { %s2121_s4 = sld [smem:[#allocation4 + $0x3]] }
 0x415   :  { %p2122_p3 = scmp.le.s32.totalorder %s2121_s4, 0 }
 0x417   :  { %717 = sbr.rel (%p2122_p3) target bundleno = 1383 (0x567), region = 33 }
 0x41c   :  { %v2157_v57 = vld [vmem:[%s3557_s2 + $0xf0] sm:$0xf]  ;;  %v2646_v58 = vld [vmem:[%s3557_s2 + $0xf4] sm:$0xf0]  ;;  %v2149_v59 = vld [vmem:[%s3557_s2 + $0xe0] sm:$0xf] }
 0x41d   :  { %v2158_v60 = vor.u32 %v2646_v58, %v2157_v57  ;;  %v2644_v61 = vld [vmem:[%s3557_s2 + $0xe4] sm:$0xf0]  ;;  %v2645_v62 = vld [vmem:[%s3557_s2 + $0xf4] sm:$0xf]  ;;  %v2159_v0 = vld [vmem:[%s3557_s2 + $0xf8] sm:$0xf0] }
 0x41e   :  { %v2150_v63 = vor.u32 %v2644_v61, %v2149_v59  ;;  %v2643_v1 = vld [vmem:[%s3557_s2 + $0xe4] sm:$0xf]  ;;  %v2151_v2 = vld [vmem:[%s3557_s2 + $0xe8] sm:$0xf0]  ;;  %v2141_v6 = vld [vmem:[%s3557_s2 + $0xd0] sm:$0xf]  ;;  %v2162_v8 = vor.u32 %v2645_v62, %v2159_v0 }
 0x41f   :  { %774 = vmatpush.bf16.msra.mxu0 %v2158_v60  ;;  %v2642_v7 = vld [vmem:[%s3557_s2 + $0xd4] sm:$0xf0]  ;;  %v2154_v9 = vor.u32 %v2643_v1, %v2151_v2  ;;  %v2641_v11 = vld [vmem:[%s3557_s2 + $0xd4] sm:$0xf]  ;;  %v2143_v12 = vld [vmem:[%s3557_s2 + $0xd8] sm:$0xf0] }
 0x420   :  { %788 = vmatpush.bf16.msra.mxu1 %v2162_v8  ;;  %v2142_v10 = vor.u32 %v2642_v7, %v2141_v6  ;;  %v2133_v13 = vld [vmem:[%s3557_s2 + $0xc0] sm:$0xf]  ;;  %v2640_v14 = vld [vmem:[%s3557_s2 + $0xc4] sm:$0xf0]  ;;  %v2146_v15 = vor.u32 %v2641_v11, %v2143_v12  ;;  %v2639_v17 = vld [vmem:[%s3557_s2 + $0xc4] sm:$0xf] }
 0x421   :  { %v2134_v16 = vor.u32 %v2640_v14, %v2133_v13  ;;  %v2135_v18 = vld [vmem:[%s3557_s2 + $0xc8] sm:$0xf0]  ;;  %v2654_v20 = vld [vmem:[%s3558_s3 + $0xf8] sm:$0xff]  ;;  %v2653_v21 = vld [vmem:[%s3558_s3 + $0xf0] sm:$0xff]  ;;  %v2849_v34 = vmov 3  }
 0x422   :  { %v2138_v19 = vor.u32 %v2639_v17, %v2135_v18  ;;  %906 = vmatpush.bf16.msra.mxu2 %v2654_v20  ;;  %v2652_v22 = vld [vmem:[%s3558_s3 + $0xe8] sm:$0xff]  ;;  %v2651_v23 = vld [vmem:[%s3558_s3 + $0xe0] sm:$0xff]  ;;  %v2650_v24 = vld [vmem:[%s3558_s3 + $0xd8] sm:$0xff]  ;;  %2759 = vset.pattern.permute.xlu0 %v2849_v34 }
 0x423   :  { %775 = vmatpush.bf16.msra.mxu0 %v2150_v63  ;;  %v2649_v25 = vld [vmem:[%s3558_s3 + $0xd0] sm:$0xff]  ;;  %v2648_v28 = vld [vmem:[%s3558_s3 + $0xc8] sm:$0xff]  ;;  %v2647_v29 = vld [vmem:[%s3558_s3 + $0xc0] sm:$0xff]  ;;  %924 = vperm.xlu0 %2759, %v2902_v4  }
 0x424   :  { %789 = vmatpush.bf16.msra.mxu1 %v2154_v9  ;;  %v920_v2 = vld [vmem:[#allocation2] sm:$0xff] }
 0x426   :  { %907 = vmatpush.bf16.msra.mxu2 %v2653_v21 }
 0x427   :  { %776 = vmatpush.bf16.msra.mxu0 %v2142_v10  ;;  %v921_v10 = vld [vmem:[#allocation2 + $0x8] sm:$0xff] }
 0x428   :  { %790 = vmatpush.bf16.msra.mxu1 %v2146_v15 }
 0x42a   :  { %908 = vmatpush.bf16.msra.mxu2 %v2652_v22 }
 0x42b   :  { %777 = vmatpush.bf16.msra.mxu0 %v2134_v16  ;;  %929 = vperm.xlu0 %2759, %v2907_v5  }
 0x42c   :  { %791 = vmatpush.bf16.msra.mxu1 %v2138_v19 }
 0x42e   :  { %2163 = vmatmul.msk.bf16.vlgmr.msra.gmra.mxu0 %vm28_vm0, %v2897_v3  ;;  %909 = vmatpush.bf16.msra.mxu2 %v2651_v23 }
 0x42f   :  { %2164 = vmatmul.msk.bf16.vlgmr.msra.gmra.mxu1 %vm28_vm0, %v2897_v3 }
 0x432   :  { %910 = vmatpush.bf16.msra.mxu2 %v2650_v24 }
 0x436   :  { %911 = vmatpush.bf16.msra.mxu2 %v2649_v25 }
 0x43a   :  { %912 = vmatpush.bf16.msra.mxu2 %v2648_v28 }
 0x43e   :  { %913 = vmatpush.bf16.msra.mxu2 %v2647_v29 }
 0x495   :  { %v925_v0 = vpop.permute.xlu0 %924 }
 0x49d   :  { %v930_v8 = vpop.permute.xlu0 %929 }
 0x4ab   :  { %v779_v26 = vpop.f32.mrf.mxu0 }
 0x4ac   :  { %v2165_v27 = vmul.f32 -1.442695, %v779_v26  ;;  %v793_v46 = vpop.f32.mrf.mxu1 }
 0x4ae   :  { %2760 = vpow2.f32 %v2165_v27 }
 0x4b3   :  { %v781_v30 = vpop.f32.mrf.mxu0 }
 0x4b4   :  { %v2761_v31 = vpop.eup %2760  ;;  %v2166_v32 = vmul.f32 -1.442695, %v781_v30  ;;  %v795_v60 = vpop.f32.mrf.mxu1 }
 0x4b5   :  { %v804_v33 = vadd.f32 1.0, %v2761_v31 }
 0x4b6   :  { %2762 = vpow2.f32 %v2166_v32 }
 0x4b7   :  { %2764 = vrcp.f32 %v804_v33  ;;  %v817_v43 = vand.u32 2147483648, %v804_v33  ;;  %vm811_vm11 = vweird.f32 %v804_v33  ;;  %v815_v44 = vand.u32 2147483647, %v804_v33 }
 0x4b9   :  { %v818_v49 = vor.u32 1.1754944e-38, %v817_v43  ;;  %vm816_vm13 = vcmp.eq.f32.partialorder %v815_v44, 8.507059e+37 }
 0x4bc   :  { %v2763_v35 = vpop.eup %2762 }
 0x4bd   :  { %v2765_v36 = vpop.eup %2764  ;;  %v805_v37 = vadd.f32 1.0, %v2763_v35 }
 0x4be   :  { %v807_v38 = vmul.f32 %v2765_v36, %v804_v33  ;;  %vm812_vm10 = vweird.f32 %v2765_v36 }
 0x4bf   :  { %2766 = vrcp.f32 %v805_v37  ;;  %vm813_vm12 = vmor %vm811_vm11, %vm812_vm10  ;;  %v832_v50 = vand.u32 2147483648, %v805_v37  ;;  %v830_v52 = vand.u32 2147483647, %v805_v37  ;;  %vm826_vm15 = vweird.f32 %v805_v37 }
 0x4c0   :  { %v808_v39 = vsub.f32 1.0, %v807_v38 }
 0x4c1   :  { %v833_v55 = vor.u32 1.1754944e-38, %v832_v50  ;;  %vm831_vm2 = vcmp.eq.f32.partialorder %v830_v52, 8.507059e+37 }
 0x4c2   :  { %v809_v40 = vmul.f32 %v2765_v36, %v808_v39 }
 0x4c4   :  { %v810_v41 = vadd.f32 %v2765_v36, %v809_v40 }
 0x4c5   :  { %v2767_v42 = vpop.eup %2766 }
 0x4c6   :  { %v822_v45 = vmul.f32 %v2767_v42, %v805_v37  ;;  %v814_v47 = vsel %vm813_vm12, %v2765_v36, %v810_v41  ;;  %vm827_vm14 = vweird.f32 %v2767_v42 }
 0x4c7   :  { %v819_v53 = vsel %vm816_vm13, %v818_v49, %v814_v47  ;;  %vm828_vm1 = vmor %vm826_vm15, %vm827_vm14 }
 0x4c8   :  { %v823_v48 = vsub.f32 1.0, %v822_v45  ;;  %v836_v56 = vmul.f32 %v819_v53, %v779_v26 }
 0x4ca   :  { %v824_v51 = vmul.f32 %v2767_v42, %v823_v48  ;;  %v838_v61 = vmul.f32 %v836_v56, %v793_v46 }
 0x4cc   :  { %v825_v54 = vadd.f32 %v2767_v42, %v824_v51 }
 0x4ce   :  { %v829_v57 = vsel %vm828_vm1, %v2767_v42, %v825_v54 }
 0x4cf   :  { %v834_v58 = vsel %vm831_vm2, %v833_v55, %v829_v57 }
 0x4d0   :  { %v837_v59 = vmul.f32 %v834_v58, %v781_v30 }
 0x4d2   :  { %v839_v62 = vmul.f32 %v837_v59, %v795_v60 }
 0x4d4   :  { %v840_v63 = vpack.c.bf16 %v839_v62, %v838_v61 }
 0x4d6   :  { %914 = vmatmul.bf16.vlgmr.msra.gmra.mxu2 %v840_v63 }
 0x559   :  { %v915_v1 = vpop.f32.mrf.mxu2 }
 0x55a   :  { %v932_v6 = vmul.f32 %v925_v0, %v915_v1 }
 0x55c   :  { %v934_v7 = vadd.f32 %v932_v6, %v920_v2 }
 0x55e   :  { %936 = vst.msk [vmem:[#allocation2] sm:$0xff] %vm28_vm0, %v934_v7 }
 0x561   :  { %v917_v9 = vpop.f32.mrf.mxu2 }
 0x562   :  { %v933_v11 = vmul.f32 %v930_v8, %v917_v9 }
 0x564   :  { %v935_v12 = vadd.f32 %v933_v11, %v921_v10 }
 0x566   :  { %937 = vst.msk [vmem:[#allocation2 + $0x8] sm:$0xff] %vm28_vm0, %v935_v12 }
 0x567 PF:  { %s2215_s29 = sld [smem:[#allocation4 + $0x4]] }
 0x56d   :  { %p2216_p4 = scmp.le.s32.totalorder %s2215_s29, 0 }
 0x56f   :  { %943 = sbr.rel (%p2216_p4) target bundleno = 1727 (0x6bf), region = 37 }
 0x574   :  { %v2251_v13 = vld [vmem:[%s3557_s2 + $0x130] sm:$0xf]  ;;  %v2662_v14 = vld [vmem:[%s3557_s2 + $0x134] sm:$0xf0]  ;;  %v2243_v15 = vld [vmem:[%s3557_s2 + $0x120] sm:$0xf] }
 0x575   :  { %v2252_v16 = vor.u32 %v2662_v14, %v2251_v13  ;;  %v2660_v17 = vld [vmem:[%s3557_s2 + $0x124] sm:$0xf0]  ;;  %v2661_v18 = vld [vmem:[%s3557_s2 + $0x134] sm:$0xf]  ;;  %v2253_v20 = vld [vmem:[%s3557_s2 + $0x138] sm:$0xf0] }
 0x576   :  { %v2244_v19 = vor.u32 %v2660_v17, %v2243_v15  ;;  %v2659_v21 = vld [vmem:[%s3557_s2 + $0x124] sm:$0xf]  ;;  %v2245_v22 = vld [vmem:[%s3557_s2 + $0x128] sm:$0xf0]  ;;  %v2235_v23 = vld [vmem:[%s3557_s2 + $0x110] sm:$0xf]  ;;  %v2256_v25 = vor.u32 %v2661_v18, %v2253_v20 }
 0x577   :  { %1000 = vmatpush.bf16.msra.mxu0 %v2252_v16  ;;  %v2658_v24 = vld [vmem:[%s3557_s2 + $0x114] sm:$0xf0]  ;;  %v2248_v26 = vor.u32 %v2659_v21, %v2245_v22  ;;  %v2657_v28 = vld [vmem:[%s3557_s2 + $0x114] sm:$0xf]  ;;  %v2237_v29 = vld [vmem:[%s3557_s2 + $0x118] sm:$0xf0] }
 0x578   :  { %1014 = vmatpush.bf16.msra.mxu1 %v2256_v25  ;;  %v2236_v27 = vor.u32 %v2658_v24, %v2235_v23  ;;  %v2227_v30 = vld [vmem:[%s3557_s2 + $0x100] sm:$0xf]  ;;  %v2656_v31 = vld [vmem:[%s3557_s2 + $0x104] sm:$0xf0]  ;;  %v2240_v32 = vor.u32 %v2657_v28, %v2237_v29  ;;  %v2655_v34 = vld [vmem:[%s3557_s2 + $0x104] sm:$0xf] }
 0x579   :  { %v2228_v33 = vor.u32 %v2656_v31, %v2227_v30  ;;  %v2229_v35 = vld [vmem:[%s3557_s2 + $0x108] sm:$0xf0]  ;;  %v2670_v37 = vld [vmem:[%s3558_s3 + $0x138] sm:$0xff]  ;;  %v2669_v38 = vld [vmem:[%s3558_s3 + $0x130] sm:$0xff]  ;;  %v2850_v51 = vmov 4  }
 0x57a   :  { %v2232_v36 = vor.u32 %v2655_v34, %v2229_v35  ;;  %1132 = vmatpush.bf16.msra.mxu2 %v2670_v37  ;;  %v2668_v39 = vld [vmem:[%s3558_s3 + $0x128] sm:$0xff]  ;;  %v2667_v40 = vld [vmem:[%s3558_s3 + $0x120] sm:$0xff]  ;;  %v2666_v41 = vld [vmem:[%s3558_s3 + $0x118] sm:$0xff]  ;;  %2768 = vset.pattern.permute.xlu0 %v2850_v51 }
 0x57b   :  { %1001 = vmatpush.bf16.msra.mxu0 %v2244_v19  ;;  %v2665_v42 = vld [vmem:[%s3558_s3 + $0x110] sm:$0xff]  ;;  %v2664_v45 = vld [vmem:[%s3558_s3 + $0x108] sm:$0xff]  ;;  %v2663_v46 = vld [vmem:[%s3558_s3 + $0x100] sm:$0xff]  ;;  %1150 = vperm.xlu0 %2768, %v2902_v4  }
 0x57c   :  { %1015 = vmatpush.bf16.msra.mxu1 %v2248_v26  ;;  %v1146_v22 = vld [vmem:[#allocation2] sm:$0xff] }
 0x57e   :  { %1133 = vmatpush.bf16.msra.mxu2 %v2669_v38 }
 0x57f   :  { %1002 = vmatpush.bf16.msra.mxu0 %v2236_v27  ;;  %v1147_v27 = vld [vmem:[#allocation2 + $0x8] sm:$0xff] }
 0x580   :  { %1016 = vmatpush.bf16.msra.mxu1 %v2240_v32 }
 0x582   :  { %1134 = vmatpush.bf16.msra.mxu2 %v2668_v39 }
 0x583   :  { %1003 = vmatpush.bf16.msra.mxu0 %v2228_v33  ;;  %1155 = vperm.xlu0 %2768, %v2907_v5  }
 0x584   :  { %1017 = vmatpush.bf16.msra.mxu1 %v2232_v36 }
 0x586   :  { %2257 = vmatmul.msk.bf16.vlgmr.msra.gmra.mxu0 %vm28_vm0, %v2897_v3  ;;  %1135 = vmatpush.bf16.msra.mxu2 %v2667_v40 }
 0x587   :  { %2258 = vmatmul.msk.bf16.vlgmr.msra.gmra.mxu1 %vm28_vm0, %v2897_v3 }
 0x58a   :  { %1136 = vmatpush.bf16.msra.mxu2 %v2666_v41 }
 0x58e   :  { %1137 = vmatpush.bf16.msra.mxu2 %v2665_v42 }
 0x592   :  { %1138 = vmatpush.bf16.msra.mxu2 %v2664_v45 }
 0x596   :  { %1139 = vmatpush.bf16.msra.mxu2 %v2663_v46 }
 0x5ed   :  { %v1151_v20 = vpop.permute.xlu0 %1150 }
 0x5f5   :  { %v1156_v25 = vpop.permute.xlu0 %1155 }
 0x603   :  { %v1005_v43 = vpop.f32.mrf.mxu0 }
 0x604   :  { %v2259_v44 = vmul.f32 -1.442695, %v1005_v43  ;;  %v1019_v63 = vpop.f32.mrf.mxu1 }
 0x606   :  { %2769 = vpow2.f32 %v2259_v44 }
 0x60b   :  { %v1007_v47 = vpop.f32.mrf.mxu0 }
 0x60c   :  { %v2770_v48 = vpop.eup %2769  ;;  %v2260_v49 = vmul.f32 -1.442695, %v1007_v47  ;;  %v1021_v16 = vpop.f32.mrf.mxu1 }
 0x60d   :  { %v1030_v50 = vadd.f32 1.0, %v2770_v48 }
 0x60e   :  { %2771 = vpow2.f32 %v2260_v49 }
 0x60f   :  { %2773 = vrcp.f32 %v1030_v50  ;;  %v1043_v60 = vand.u32 2147483648, %v1030_v50  ;;  %vm1037_vm4 = vweird.f32 %v1030_v50  ;;  %v1041_v61 = vand.u32 2147483647, %v1030_v50 }
 0x611   :  { %v1044_v2 = vor.u32 1.1754944e-38, %v1043_v60  ;;  %vm1042_vm6 = vcmp.eq.f32.partialorder %v1041_v61, 8.507059e+37 }
 0x614   :  { %v2772_v52 = vpop.eup %2771 }
 0x615   :  { %v2774_v53 = vpop.eup %2773  ;;  %v1031_v54 = vadd.f32 1.0, %v2772_v52 }
 0x616   :  { %v1033_v55 = vmul.f32 %v2774_v53, %v1030_v50  ;;  %vm1038_vm3 = vweird.f32 %v2774_v53 }
 0x617   :  { %2775 = vrcp.f32 %v1031_v54  ;;  %vm1039_vm5 = vmor %vm1037_vm4, %vm1038_vm3  ;;  %v1058_v6 = vand.u32 2147483648, %v1031_v54  ;;  %v1056_v8 = vand.u32 2147483647, %v1031_v54  ;;  %vm1052_vm8 = vweird.f32 %v1031_v54 }
 0x618   :  { %v1034_v56 = vsub.f32 1.0, %v1033_v55 }
 0x619   :  { %v1059_v11 = vor.u32 1.1754944e-38, %v1058_v6  ;;  %vm1057_vm10 = vcmp.eq.f32.partialorder %v1056_v8, 8.507059e+37 }
 0x61a   :  { %v1035_v57 = vmul.f32 %v2774_v53, %v1034_v56 }
 0x61c   :  { %v1036_v58 = vadd.f32 %v2774_v53, %v1035_v57 }
 0x61d   :  { %v2776_v59 = vpop.eup %2775 }
 0x61e   :  { %v1048_v62 = vmul.f32 %v2776_v59, %v1031_v54  ;;  %v1040_v0 = vsel %vm1039_vm5, %v2774_v53, %v1036_v58  ;;  %vm1053_vm7 = vweird.f32 %v2776_v59 }
 0x61f   :  { %v1045_v9 = vsel %vm1042_vm6, %v1044_v2, %v1040_v0  ;;  %vm1054_vm9 = vmor %vm1052_vm8, %vm1053_vm7 }
 0x620   :  { %v1049_v1 = vsub.f32 1.0, %v1048_v62  ;;  %v1062_v12 = vmul.f32 %v1045_v9, %v1005_v43 }
 0x622   :  { %v1050_v7 = vmul.f32 %v2776_v59, %v1049_v1  ;;  %v1064_v17 = vmul.f32 %v1062_v12, %v1019_v63 }
 0x624   :  { %v1051_v10 = vadd.f32 %v2776_v59, %v1050_v7 }
 0x626   :  { %v1055_v13 = vsel %vm1054_vm9, %v2776_v59, %v1051_v10 }
 0x627   :  { %v1060_v14 = vsel %vm1057_vm10, %v1059_v11, %v1055_v13 }
 0x628   :  { %v1063_v15 = vmul.f32 %v1060_v14, %v1007_v47 }
 0x62a   :  { %v1065_v18 = vmul.f32 %v1063_v15, %v1021_v16 }
 0x62c   :  { %v1066_v19 = vpack.c.bf16 %v1065_v18, %v1064_v17 }
 0x62e   :  { %1140 = vmatmul.bf16.vlgmr.msra.gmra.mxu2 %v1066_v19 }
 0x6b1   :  { %v1141_v21 = vpop.f32.mrf.mxu2 }
 0x6b2   :  { %v1158_v23 = vmul.f32 %v1151_v20, %v1141_v21 }
 0x6b4   :  { %v1160_v24 = vadd.f32 %v1158_v23, %v1146_v22 }
 0x6b6   :  { %1162 = vst.msk [vmem:[#allocation2] sm:$0xff] %vm28_vm0, %v1160_v24 }
 0x6b9   :  { %v1143_v26 = vpop.f32.mrf.mxu2 }
 0x6ba   :  { %v1159_v28 = vmul.f32 %v1156_v25, %v1143_v26 }
 0x6bc   :  { %v1161_v29 = vadd.f32 %v1159_v28, %v1147_v27 }
 0x6be   :  { %1163 = vst.msk [vmem:[#allocation2 + $0x8] sm:$0xff] %vm28_vm0, %v1161_v29 }
 0x6bf PF:  { %s2309_s23 = sld [smem:[#allocation4 + $0x5]] }
 0x6c5   :  { %p2310_p5 = scmp.le.s32.totalorder %s2309_s23, 0 }
 0x6c7   :  { %1169 = sbr.rel (%p2310_p5) target bundleno = 2071 (0x817), region = 41 }
 0x6cc   :  { %v2345_v30 = vld [vmem:[%s3557_s2 + $0x170] sm:$0xf]  ;;  %v2678_v31 = vld [vmem:[%s3557_s2 + $0x174] sm:$0xf0]  ;;  %v2337_v32 = vld [vmem:[%s3557_s2 + $0x160] sm:$0xf] }
 0x6cd   :  { %v2346_v33 = vor.u32 %v2678_v31, %v2345_v30  ;;  %v2676_v34 = vld [vmem:[%s3557_s2 + $0x164] sm:$0xf0]  ;;  %v2677_v35 = vld [vmem:[%s3557_s2 + $0x174] sm:$0xf]  ;;  %v2347_v37 = vld [vmem:[%s3557_s2 + $0x178] sm:$0xf0] }
 0x6ce   :  { %v2338_v36 = vor.u32 %v2676_v34, %v2337_v32  ;;  %v2675_v38 = vld [vmem:[%s3557_s2 + $0x164] sm:$0xf]  ;;  %v2339_v39 = vld [vmem:[%s3557_s2 + $0x168] sm:$0xf0]  ;;  %v2329_v40 = vld [vmem:[%s3557_s2 + $0x150] sm:$0xf]  ;;  %v2350_v42 = vor.u32 %v2677_v35, %v2347_v37 }
 0x6cf   :  { %1226 = vmatpush.bf16.msra.mxu0 %v2346_v33  ;;  %v2674_v41 = vld [vmem:[%s3557_s2 + $0x154] sm:$0xf0]  ;;  %v2342_v43 = vor.u32 %v2675_v38, %v2339_v39  ;;  %v2673_v45 = vld [vmem:[%s3557_s2 + $0x154] sm:$0xf]  ;;  %v2331_v46 = vld [vmem:[%s3557_s2 + $0x158] sm:$0xf0] }
 0x6d0   :  { %1240 = vmatpush.bf16.msra.mxu1 %v2350_v42  ;;  %v2330_v44 = vor.u32 %v2674_v41, %v2329_v40  ;;  %v2321_v47 = vld [vmem:[%s3557_s2 + $0x140] sm:$0xf]  ;;  %v2672_v48 = vld [vmem:[%s3557_s2 + $0x144] sm:$0xf0]  ;;  %v2334_v49 = vor.u32 %v2673_v45, %v2331_v46  ;;  %v2671_v51 = vld [vmem:[%s3557_s2 + $0x144] sm:$0xf] }
 0x6d1   :  { %v2322_v50 = vor.u32 %v2672_v48, %v2321_v47  ;;  %v2323_v52 = vld [vmem:[%s3557_s2 + $0x148] sm:$0xf0]  ;;  %v2686_v54 = vld [vmem:[%s3558_s3 + $0x178] sm:$0xff]  ;;  %v2685_v55 = vld [vmem:[%s3558_s3 + $0x170] sm:$0xff]  ;;  %v2851_v7 = vmov 5  }
 0x6d2   :  { %v2326_v53 = vor.u32 %v2671_v51, %v2323_v52  ;;  %1358 = vmatpush.bf16.msra.mxu2 %v2686_v54  ;;  %v2684_v56 = vld [vmem:[%s3558_s3 + $0x168] sm:$0xff]  ;;  %v2683_v57 = vld [vmem:[%s3558_s3 + $0x160] sm:$0xff]  ;;  %v2682_v58 = vld [vmem:[%s3558_s3 + $0x158] sm:$0xff]  ;;  %2777 = vset.pattern.permute.xlu0 %v2851_v7 }
 0x6d3   :  { %1227 = vmatpush.bf16.msra.mxu0 %v2338_v36  ;;  %v2681_v59 = vld [vmem:[%s3558_s3 + $0x150] sm:$0xff]  ;;  %v2680_v62 = vld [vmem:[%s3558_s3 + $0x148] sm:$0xff]  ;;  %v2679_v63 = vld [vmem:[%s3558_s3 + $0x140] sm:$0xff]  ;;  %1376 = vperm.xlu0 %2777, %v2902_v4  }
 0x6d4   :  { %1241 = vmatpush.bf16.msra.mxu1 %v2342_v43  ;;  %v1372_v39 = vld [vmem:[#allocation2] sm:$0xff] }
 0x6d6   :  { %1359 = vmatpush.bf16.msra.mxu2 %v2685_v55 }
 0x6d7   :  { %1228 = vmatpush.bf16.msra.mxu0 %v2330_v44  ;;  %v1373_v44 = vld [vmem:[#allocation2 + $0x8] sm:$0xff] }
 0x6d8   :  { %1242 = vmatpush.bf16.msra.mxu1 %v2334_v49 }
 0x6da   :  { %1360 = vmatpush.bf16.msra.mxu2 %v2684_v56 }
 0x6db   :  { %1229 = vmatpush.bf16.msra.mxu0 %v2322_v50  ;;  %1381 = vperm.xlu0 %2777, %v2907_v5  }
 0x6dc   :  { %1243 = vmatpush.bf16.msra.mxu1 %v2326_v53 }
 0x6de   :  { %2351 = vmatmul.msk.bf16.vlgmr.msra.gmra.mxu0 %vm28_vm0, %v2897_v3  ;;  %1361 = vmatpush.bf16.msra.mxu2 %v2683_v57 }
 0x6df   :  { %2352 = vmatmul.msk.bf16.vlgmr.msra.gmra.mxu1 %vm28_vm0, %v2897_v3 }
 0x6e2   :  { %1362 = vmatpush.bf16.msra.mxu2 %v2682_v58 }
 0x6e6   :  { %1363 = vmatpush.bf16.msra.mxu2 %v2681_v59 }
 0x6ea   :  { %1364 = vmatpush.bf16.msra.mxu2 %v2680_v62 }
 0x6ee   :  { %1365 = vmatpush.bf16.msra.mxu2 %v2679_v63 }
 0x745   :  { %v1377_v37 = vpop.permute.xlu0 %1376 }
 0x74d   :  { %v1382_v42 = vpop.permute.xlu0 %1381 }
 0x75b   :  { %v1231_v60 = vpop.f32.mrf.mxu0 }
 0x75c   :  { %v2353_v61 = vmul.f32 -1.442695, %v1231_v60  ;;  %v1245_v19 = vpop.f32.mrf.mxu1 }
 0x75e   :  { %2778 = vpow2.f32 %v2353_v61 }
 0x763   :  { %v1233_v0 = vpop.f32.mrf.mxu0 }
 0x764   :  { %v2779_v1 = vpop.eup %2778  ;;  %v2354_v2 = vmul.f32 -1.442695, %v1233_v0  ;;  %v1247_v33 = vpop.f32.mrf.mxu1 }
 0x765   :  { %v1256_v6 = vadd.f32 1.0, %v2779_v1 }
 0x766   :  { %2780 = vpow2.f32 %v2354_v2 }
 0x767   :  { %2782 = vrcp.f32 %v1256_v6  ;;  %v1269_v16 = vand.u32 2147483648, %v1256_v6  ;;  %vm1263_vm12 = vweird.f32 %v1256_v6  ;;  %v1267_v17 = vand.u32 2147483647, %v1256_v6 }
 0x769   :  { %v1270_v22 = vor.u32 1.1754944e-38, %v1269_v16  ;;  %vm1268_vm14 = vcmp.eq.f32.partialorder %v1267_v17, 8.507059e+37 }
 0x76c   :  { %v2781_v8 = vpop.eup %2780 }
 0x76d   :  { %v2783_v9 = vpop.eup %2782  ;;  %v1257_v10 = vadd.f32 1.0, %v2781_v8 }
 0x76e   :  { %v1259_v11 = vmul.f32 %v2783_v9, %v1256_v6  ;;  %vm1264_vm11 = vweird.f32 %v2783_v9 }
 0x76f   :  { %2784 = vrcp.f32 %v1257_v10  ;;  %vm1265_vm13 = vmor %vm1263_vm12, %vm1264_vm11  ;;  %v1284_v23 = vand.u32 2147483648, %v1257_v10  ;;  %v1282_v25 = vand.u32 2147483647, %v1257_v10  ;;  %vm1278_vm1 = vweird.f32 %v1257_v10 }
 0x770   :  { %v1260_v12 = vsub.f32 1.0, %v1259_v11 }
 0x771   :  { %v1285_v28 = vor.u32 1.1754944e-38, %v1284_v23  ;;  %vm1283_vm3 = vcmp.eq.f32.partialorder %v1282_v25, 8.507059e+37 }
 0x772   :  { %v1261_v13 = vmul.f32 %v2783_v9, %v1260_v12 }
 0x774   :  { %v1262_v14 = vadd.f32 %v2783_v9, %v1261_v13 }
 0x775   :  { %v2785_v15 = vpop.eup %2784 }
 0x776   :  { %v1274_v18 = vmul.f32 %v2785_v15, %v1257_v10  ;;  %v1266_v20 = vsel %vm1265_vm13, %v2783_v9, %v1262_v14  ;;  %vm1279_vm15 = vweird.f32 %v2785_v15 }
 0x777   :  { %v1271_v26 = vsel %vm1268_vm14, %v1270_v22, %v1266_v20  ;;  %vm1280_vm2 = vmor %vm1278_vm1, %vm1279_vm15 }
 0x778   :  { %v1275_v21 = vsub.f32 1.0, %v1274_v18  ;;  %v1288_v29 = vmul.f32 %v1271_v26, %v1231_v60 }
 0x77a   :  { %v1276_v24 = vmul.f32 %v2785_v15, %v1275_v21  ;;  %v1290_v34 = vmul.f32 %v1288_v29, %v1245_v19 }
 0x77c   :  { %v1277_v27 = vadd.f32 %v2785_v15, %v1276_v24 }
 0x77e   :  { %v1281_v30 = vsel %vm1280_vm2, %v2785_v15, %v1277_v27 }
 0x77f   :  { %v1286_v31 = vsel %vm1283_vm3, %v1285_v28, %v1281_v30 }
 0x780   :  { %v1289_v32 = vmul.f32 %v1286_v31, %v1233_v0 }
 0x782   :  { %v1291_v35 = vmul.f32 %v1289_v32, %v1247_v33 }
 0x784   :  { %v1292_v36 = vpack.c.bf16 %v1291_v35, %v1290_v34 }
 0x786   :  { %1366 = vmatmul.bf16.vlgmr.msra.gmra.mxu2 %v1292_v36 }
 0x809   :  { %v1367_v38 = vpop.f32.mrf.mxu2 }
 0x80a   :  { %v1384_v40 = vmul.f32 %v1377_v37, %v1367_v38 }
 0x80c   :  { %v1386_v41 = vadd.f32 %v1384_v40, %v1372_v39 }
 0x80e   :  { %1388 = vst.msk [vmem:[#allocation2] sm:$0xff] %vm28_vm0, %v1386_v41 }
 0x811   :  { %v1369_v43 = vpop.f32.mrf.mxu2 }
 0x812   :  { %v1385_v45 = vmul.f32 %v1382_v42, %v1369_v43 }
 0x814   :  { %v1387_v46 = vadd.f32 %v1385_v45, %v1373_v44 }
 0x816   :  { %1389 = vst.msk [vmem:[#allocation2 + $0x8] sm:$0xff] %vm28_vm0, %v1387_v46 }
 0x817 PF:  { %s2403_s16 = sld [smem:[#allocation4 + $0x6]] }
 0x81d   :  { %p2404_p6 = scmp.le.s32.totalorder %s2403_s16, 0 }
 0x81f   :  { %1395 = sbr.rel (%p2404_p6) target bundleno = 2415 (0x96f), region = 45 }
 0x824   :  { %v2439_v47 = vld [vmem:[%s3557_s2 + $0x1b0] sm:$0xf]  ;;  %v2694_v48 = vld [vmem:[%s3557_s2 + $0x1b4] sm:$0xf0]  ;;  %v2431_v49 = vld [vmem:[%s3557_s2 + $0x1a0] sm:$0xf] }
 0x825   :  { %v2440_v50 = vor.u32 %v2694_v48, %v2439_v47  ;;  %v2692_v51 = vld [vmem:[%s3557_s2 + $0x1a4] sm:$0xf0]  ;;  %v2693_v52 = vld [vmem:[%s3557_s2 + $0x1b4] sm:$0xf]  ;;  %v2441_v54 = vld [vmem:[%s3557_s2 + $0x1b8] sm:$0xf0] }
 0x826   :  { %v2432_v53 = vor.u32 %v2692_v51, %v2431_v49  ;;  %v2691_v55 = vld [vmem:[%s3557_s2 + $0x1a4] sm:$0xf]  ;;  %v2433_v56 = vld [vmem:[%s3557_s2 + $0x1a8] sm:$0xf0]  ;;  %v2423_v57 = vld [vmem:[%s3557_s2 + $0x190] sm:$0xf]  ;;  %v2444_v59 = vor.u32 %v2693_v52, %v2441_v54 }
 0x827   :  { %1452 = vmatpush.bf16.msra.mxu0 %v2440_v50  ;;  %v2690_v58 = vld [vmem:[%s3557_s2 + $0x194] sm:$0xf0]  ;;  %v2436_v60 = vor.u32 %v2691_v55, %v2433_v56  ;;  %v2689_v62 = vld [vmem:[%s3557_s2 + $0x194] sm:$0xf]  ;;  %v2425_v63 = vld [vmem:[%s3557_s2 + $0x198] sm:$0xf0] }
 0x828   :  { %1466 = vmatpush.bf16.msra.mxu1 %v2444_v59  ;;  %v2424_v61 = vor.u32 %v2690_v58, %v2423_v57  ;;  %v2415_v0 = vld [vmem:[%s3557_s2 + $0x180] sm:$0xf]  ;;  %v2688_v1 = vld [vmem:[%s3557_s2 + $0x184] sm:$0xf0]  ;;  %v2428_v2 = vor.u32 %v2689_v62, %v2425_v63  ;;  %v2687_v7 = vld [vmem:[%s3557_s2 + $0x184] sm:$0xf] }
 0x829   :  { %v2416_v6 = vor.u32 %v2688_v1, %v2415_v0  ;;  %v2417_v8 = vld [vmem:[%s3557_s2 + $0x188] sm:$0xf0]  ;;  %v2702_v10 = vld [vmem:[%s3558_s3 + $0x1b8] sm:$0xff]  ;;  %v2701_v11 = vld [vmem:[%s3558_s3 + $0x1b0] sm:$0xff]  ;;  %v2852_v24 = vmov 6  }
 0x82a   :  { %v2420_v9 = vor.u32 %v2687_v7, %v2417_v8  ;;  %1584 = vmatpush.bf16.msra.mxu2 %v2702_v10  ;;  %v2700_v12 = vld [vmem:[%s3558_s3 + $0x1a8] sm:$0xff]  ;;  %v2699_v13 = vld [vmem:[%s3558_s3 + $0x1a0] sm:$0xff]  ;;  %v2698_v14 = vld [vmem:[%s3558_s3 + $0x198] sm:$0xff]  ;;  %2786 = vset.pattern.permute.xlu0 %v2852_v24 }
 0x82b   :  { %1453 = vmatpush.bf16.msra.mxu0 %v2432_v53  ;;  %v2697_v15 = vld [vmem:[%s3558_s3 + $0x190] sm:$0xff]  ;;  %v2696_v18 = vld [vmem:[%s3558_s3 + $0x188] sm:$0xff]  ;;  %v2695_v19 = vld [vmem:[%s3558_s3 + $0x180] sm:$0xff]  ;;  %1602 = vperm.xlu0 %2786, %v2902_v4  }
 0x82c   :  { %1467 = vmatpush.bf16.msra.mxu1 %v2436_v60  ;;  %v1598_v56 = vld [vmem:[#allocation2] sm:$0xff] }
 0x82e   :  { %1585 = vmatpush.bf16.msra.mxu2 %v2701_v11 }
 0x82f   :  { %1454 = vmatpush.bf16.msra.mxu0 %v2424_v61  ;;  %v1599_v61 = vld [vmem:[#allocation2 + $0x8] sm:$0xff] }
 0x830   :  { %1468 = vmatpush.bf16.msra.mxu1 %v2428_v2 }
 0x832   :  { %1586 = vmatpush.bf16.msra.mxu2 %v2700_v12 }
 0x833   :  { %1455 = vmatpush.bf16.msra.mxu0 %v2416_v6  ;;  %1607 = vperm.xlu0 %2786, %v2907_v5  }
 0x834   :  { %1469 = vmatpush.bf16.msra.mxu1 %v2420_v9 }
 0x836   :  { %2445 = vmatmul.msk.bf16.vlgmr.msra.gmra.mxu0 %vm28_vm0, %v2897_v3  ;;  %1587 = vmatpush.bf16.msra.mxu2 %v2699_v13 }
 0x837   :  { %2446 = vmatmul.msk.bf16.vlgmr.msra.gmra.mxu1 %vm28_vm0, %v2897_v3 }
 0x83a   :  { %1588 = vmatpush.bf16.msra.mxu2 %v2698_v14 }
 0x83e   :  { %1589 = vmatpush.bf16.msra.mxu2 %v2697_v15 }
 0x842   :  { %1590 = vmatpush.bf16.msra.mxu2 %v2696_v18 }
 0x846   :  { %1591 = vmatpush.bf16.msra.mxu2 %v2695_v19 }
 0x89d   :  { %v1603_v54 = vpop.permute.xlu0 %1602 }
 0x8a5   :  { %v1608_v59 = vpop.permute.xlu0 %1607 }
 0x8b3   :  { %v1457_v16 = vpop.f32.mrf.mxu0 }
 0x8b4   :  { %v2447_v17 = vmul.f32 -1.442695, %v1457_v16  ;;  %v1471_v36 = vpop.f32.mrf.mxu1 }
 0x8b6   :  { %2787 = vpow2.f32 %v2447_v17 }
 0x8bb   :  { %v1459_v20 = vpop.f32.mrf.mxu0 }
 0x8bc   :  { %v2788_v21 = vpop.eup %2787  ;;  %v2448_v22 = vmul.f32 -1.442695, %v1459_v20  ;;  %v1473_v50 = vpop.f32.mrf.mxu1 }
 0x8bd   :  { %v1482_v23 = vadd.f32 1.0, %v2788_v21 }
 0x8be   :  { %2789 = vpow2.f32 %v2448_v22 }
 0x8bf   :  { %2791 = vrcp.f32 %v1482_v23  ;;  %v1495_v33 = vand.u32 2147483648, %v1482_v23  ;;  %vm1489_vm5 = vweird.f32 %v1482_v23  ;;  %v1493_v34 = vand.u32 2147483647, %v1482_v23 }
 0x8c1   :  { %v1496_v39 = vor.u32 1.1754944e-38, %v1495_v33  ;;  %vm1494_vm7 = vcmp.eq.f32.partialorder %v1493_v34, 8.507059e+37 }
 0x8c4   :  { %v2790_v25 = vpop.eup %2789 }
 0x8c5   :  { %v2792_v26 = vpop.eup %2791  ;;  %v1483_v27 = vadd.f32 1.0, %v2790_v25 }
 0x8c6   :  { %v1485_v28 = vmul.f32 %v2792_v26, %v1482_v23  ;;  %vm1490_vm4 = vweird.f32 %v2792_v26 }
 0x8c7   :  { %2793 = vrcp.f32 %v1483_v27  ;;  %vm1491_vm6 = vmor %vm1489_vm5, %vm1490_vm4  ;;  %v1510_v40 = vand.u32 2147483648, %v1483_v27  ;;  %v1508_v42 = vand.u32 2147483647, %v1483_v27  ;;  %vm1504_vm9 = vweird.f32 %v1483_v27 }
 0x8c8   :  { %v1486_v29 = vsub.f32 1.0, %v1485_v28 }
 0x8c9   :  { %v1511_v45 = vor.u32 1.1754944e-38, %v1510_v40  ;;  %vm1509_vm11 = vcmp.eq.f32.partialorder %v1508_v42, 8.507059e+37 }
 0x8ca   :  { %v1487_v30 = vmul.f32 %v2792_v26, %v1486_v29 }
 0x8cc   :  { %v1488_v31 = vadd.f32 %v2792_v26, %v1487_v30 }
 0x8cd   :  { %v2794_v32 = vpop.eup %2793 }
 0x8ce   :  { %v1500_v35 = vmul.f32 %v2794_v32, %v1483_v27  ;;  %v1492_v37 = vsel %vm1491_vm6, %v2792_v26, %v1488_v31  ;;  %vm1505_vm8 = vweird.f32 %v2794_v32 }
 0x8cf   :  { %v1497_v43 = vsel %vm1494_vm7, %v1496_v39, %v1492_v37  ;;  %vm1506_vm10 = vmor %vm1504_vm9, %vm1505_vm8 }
 0x8d0   :  { %v1501_v38 = vsub.f32 1.0, %v1500_v35  ;;  %v1514_v46 = vmul.f32 %v1497_v43, %v1457_v16 }
 0x8d2   :  { %v1502_v41 = vmul.f32 %v2794_v32, %v1501_v38  ;;  %v1516_v51 = vmul.f32 %v1514_v46, %v1471_v36 }
 0x8d4   :  { %v1503_v44 = vadd.f32 %v2794_v32, %v1502_v41 }
 0x8d6   :  { %v1507_v47 = vsel %vm1506_vm10, %v2794_v32, %v1503_v44 }
 0x8d7   :  { %v1512_v48 = vsel %vm1509_vm11, %v1511_v45, %v1507_v47 }
 0x8d8   :  { %v1515_v49 = vmul.f32 %v1512_v48, %v1459_v20 }
 0x8da   :  { %v1517_v52 = vmul.f32 %v1515_v49, %v1473_v50 }
 0x8dc   :  { %v1518_v53 = vpack.c.bf16 %v1517_v52, %v1516_v51 }
 0x8de   :  { %1592 = vmatmul.bf16.vlgmr.msra.gmra.mxu2 %v1518_v53 }
 0x961   :  { %v1593_v55 = vpop.f32.mrf.mxu2 }
 0x962   :  { %v1610_v57 = vmul.f32 %v1603_v54, %v1593_v55 }
 0x964   :  { %v1612_v58 = vadd.f32 %v1610_v57, %v1598_v56 }
 0x966   :  { %1614 = vst.msk [vmem:[#allocation2] sm:$0xff] %vm28_vm0, %v1612_v58 }
 0x969   :  { %v1595_v60 = vpop.f32.mrf.mxu2 }
 0x96a   :  { %v1611_v62 = vmul.f32 %v1608_v59, %v1595_v60 }
 0x96c   :  { %v1613_v63 = vadd.f32 %v1611_v62, %v1599_v61 }
 0x96e   :  { %1615 = vst.msk [vmem:[#allocation2 + $0x8] sm:$0xff] %vm28_vm0, %v1613_v63 }
 0x96f PF:  { %s2497_s4 = sld [smem:[#allocation4 + $0x7]] }
 0x975   :  { %p2498_p7 = scmp.le.s32.totalorder %s2497_s4, 0 }
 0x977   :  { %1621 = sbr.rel (%p2498_p7) target bundleno = 2759 (0xac7), region = 49 }
 0x97c   :  { %v2533_v0 = vld [vmem:[%s3557_s2 + $0x1f0] sm:$0xf]  ;;  %v2710_v1 = vld [vmem:[%s3557_s2 + $0x1f4] sm:$0xf0]  ;;  %v2525_v2 = vld [vmem:[%s3557_s2 + $0x1e0] sm:$0xf] }
 0x97d   :  { %v2534_v6 = vor.u32 %v2710_v1, %v2533_v0  ;;  %v2708_v7 = vld [vmem:[%s3557_s2 + $0x1e4] sm:$0xf0]  ;;  %v2709_v8 = vld [vmem:[%s3557_s2 + $0x1f4] sm:$0xf]  ;;  %v2535_v10 = vld [vmem:[%s3557_s2 + $0x1f8] sm:$0xf0] }
 0x97e   :  { %v2526_v9 = vor.u32 %v2708_v7, %v2525_v2  ;;  %v2707_v11 = vld [vmem:[%s3557_s2 + $0x1e4] sm:$0xf]  ;;  %v2527_v12 = vld [vmem:[%s3557_s2 + $0x1e8] sm:$0xf0]  ;;  %v2517_v13 = vld [vmem:[%s3557_s2 + $0x1d0] sm:$0xf]  ;;  %v2538_v15 = vor.u32 %v2709_v8, %v2535_v10 }
 0x97f   :  { %1678 = vmatpush.bf16.msra.mxu0 %v2534_v6  ;;  %v2706_v14 = vld [vmem:[%s3557_s2 + $0x1d4] sm:$0xf0]  ;;  %v2530_v16 = vor.u32 %v2707_v11, %v2527_v12  ;;  %v2705_v18 = vld [vmem:[%s3557_s2 + $0x1d4] sm:$0xf]  ;;  %v2519_v19 = vld [vmem:[%s3557_s2 + $0x1d8] sm:$0xf0] }
 0x980   :  { %1692 = vmatpush.bf16.msra.mxu1 %v2538_v15  ;;  %v2518_v17 = vor.u32 %v2706_v14, %v2517_v13  ;;  %v2509_v20 = vld [vmem:[%s3557_s2 + $0x1c0] sm:$0xf]  ;;  %v2704_v21 = vld [vmem:[%s3557_s2 + $0x1c4] sm:$0xf0]  ;;  %v2522_v22 = vor.u32 %v2705_v18, %v2519_v19  ;;  %v2703_v24 = vld [vmem:[%s3557_s2 + $0x1c4] sm:$0xf] }
 0x981   :  { %v2510_v23 = vor.u32 %v2704_v21, %v2509_v20  ;;  %v2511_v25 = vld [vmem:[%s3557_s2 + $0x1c8] sm:$0xf0]  ;;  %v2718_v27 = vld [vmem:[%s3558_s3 + $0x1f8] sm:$0xff]  ;;  %v2717_v28 = vld [vmem:[%s3558_s3 + $0x1f0] sm:$0xff]  ;;  %v2853_v40 = vmov 7  }
 0x982   :  { %v2514_v26 = vor.u32 %v2703_v24, %v2511_v25  ;;  %1810 = vmatpush.bf16.msra.mxu2 %v2718_v27  ;;  %v2716_v29 = vld [vmem:[%s3558_s3 + $0x1e8] sm:$0xff]  ;;  %v2715_v30 = vld [vmem:[%s3558_s3 + $0x1e0] sm:$0xff]  ;;  %v2713_v31 = vld [vmem:[%s3558_s3 + $0x1d0] sm:$0xff]  ;;  %2795 = vset.pattern.permute.xlu0 %v2853_v40 }
 0x983   :  { %1679 = vmatpush.bf16.msra.mxu0 %v2526_v9  ;;  %v2712_v34 = vld [vmem:[%s3558_s3 + $0x1c8] sm:$0xff]  ;;  %v2711_v35 = vld [vmem:[%s3558_s3 + $0x1c0] sm:$0xff]  ;;  %1828 = vperm.xlu0 %2795, %v2902_v4  }
 0x984   :  { %1693 = vmatpush.bf16.msra.mxu1 %v2530_v16  ;;  %v1824_v9 = vld [vmem:[#allocation2] sm:$0xff]  ;;  %v1825_v14 = vld [vmem:[#allocation2 + $0x8] sm:$0xff] }
 0x986   :  { %1811 = vmatpush.bf16.msra.mxu2 %v2717_v28 }
 0x987   :  { %1680 = vmatpush.bf16.msra.mxu0 %v2518_v17 }
 0x988   :  { %1694 = vmatpush.bf16.msra.mxu1 %v2522_v22 }
 0x98a   :  { %1812 = vmatpush.bf16.msra.mxu2 %v2716_v29 }
 0x98b   :  { %1681 = vmatpush.bf16.msra.mxu0 %v2510_v23  ;;  %1833 = vperm.xlu0 %2795, %v2907_v5  }
 0x98c   :  { %1695 = vmatpush.bf16.msra.mxu1 %v2514_v26 }
 0x98e   :  { %2539 = vmatmul.msk.bf16.vlgmr.msra.gmra.mxu0 %vm28_vm0, %v2897_v3  ;;  %1813 = vmatpush.bf16.msra.mxu2 %v2715_v30 }
 0x98f   :  { %2540 = vmatmul.msk.bf16.vlgmr.msra.gmra.mxu1 %vm28_vm0, %v2897_v3  ;;  %v2714_v3 = vld [vmem:[%s3558_s3 + $0x1d8] sm:$0xff] }
 0x992   :  { %1814 = vmatpush.bf16.msra.mxu2 %v2714_v3 }
 0x996   :  { %1815 = vmatpush.bf16.msra.mxu2 %v2713_v31 }
 0x99a   :  { %1816 = vmatpush.bf16.msra.mxu2 %v2712_v34 }
 0x99e   :  { %1817 = vmatpush.bf16.msra.mxu2 %v2711_v35 }
 0x9f5   :  { %v1829_v7 = vpop.permute.xlu0 %1828 }
 0x9fd   :  { %v1834_v12 = vpop.permute.xlu0 %1833 }
 0xa0b   :  { %v1683_v32 = vpop.f32.mrf.mxu0 }
 0xa0c   :  { %v2541_v33 = vmul.f32 -1.442695, %v1683_v32  ;;  %v1697_v52 = vpop.f32.mrf.mxu1 }
 0xa0e   :  { %2796 = vpow2.f32 %v2541_v33 }
 0xa13   :  { %v1685_v36 = vpop.f32.mrf.mxu0 }
 0xa14   :  { %v2797_v37 = vpop.eup %2796  ;;  %v2542_v38 = vmul.f32 -1.442695, %v1685_v36  ;;  %v1699_v0 = vpop.f32.mrf.mxu1 }
 0xa15   :  { %v1708_v39 = vadd.f32 1.0, %v2797_v37 }
 0xa16   :  { %2798 = vpow2.f32 %v2542_v38 }
 0xa17   :  { %2800 = vrcp.f32 %v1708_v39  ;;  %v1721_v49 = vand.u32 2147483648, %v1708_v39  ;;  %vm1715_vm13 = vweird.f32 %v1708_v39  ;;  %v1719_v50 = vand.u32 2147483647, %v1708_v39 }
 0xa19   :  { %v1722_v54 = vor.u32 1.1754944e-38, %v1721_v49  ;;  %vm1720_vm15 = vcmp.eq.f32.partialorder %v1719_v50, 8.507059e+37 }
 0xa1c   :  { %v2799_v41 = vpop.eup %2798 }
 0xa1d   :  { %v2801_v42 = vpop.eup %2800  ;;  %v1709_v43 = vadd.f32 1.0, %v2799_v41 }
 0xa1e   :  { %v1711_v44 = vmul.f32 %v2801_v42, %v1708_v39  ;;  %vm1716_vm12 = vweird.f32 %v2801_v42 }
 0xa1f   :  { %2802 = vrcp.f32 %v1709_v43  ;;  %vm1717_vm14 = vmor %vm1715_vm13, %vm1716_vm12  ;;  %v1736_v55 = vand.u32 2147483648, %v1709_v43  ;;  %v1734_v57 = vand.u32 2147483647, %v1709_v43  ;;  %vm1730_vm2 = vweird.f32 %v1709_v43 }
 0xa20   :  { %v1712_v45 = vsub.f32 1.0, %v1711_v44 }
 0xa21   :  { %v1737_v59 = vor.u32 1.1754944e-38, %v1736_v55  ;;  %vm1735_vm4 = vcmp.eq.f32.partialorder %v1734_v57, 8.507059e+37 }
 0xa22   :  { %v1713_v46 = vmul.f32 %v2801_v42, %v1712_v45 }
 0xa24   :  { %v1714_v47 = vadd.f32 %v2801_v42, %v1713_v46 }
 0xa25   :  { %v2803_v48 = vpop.eup %2802 }
 0xa26   :  { %v1726_v51 = vmul.f32 %v2803_v48, %v1709_v43  ;;  %v1718_v53 = vsel %vm1717_vm14, %v2801_v42, %v1714_v47  ;;  %vm1731_vm1 = vweird.f32 %v2803_v48 }
 0xa27   :  { %v1723_v58 = vsel %vm1720_vm15, %v1722_v54, %v1718_v53  ;;  %vm1732_vm3 = vmor %vm1730_vm2, %vm1731_vm1 }
 0xa28   :  { %v1727_v4 = vsub.f32 1.0, %v1726_v51  ;;  %v1740_v60 = vmul.f32 %v1723_v58, %v1683_v32 }
 0xa2a   :  { %v1728_v56 = vmul.f32 %v2803_v48, %v1727_v4  ;;  %v1742_v1 = vmul.f32 %v1740_v60, %v1697_v52 }
 0xa2c   :  { %v1729_v5 = vadd.f32 %v2803_v48, %v1728_v56 }
 0xa2e   :  { %v1733_v61 = vsel %vm1732_vm3, %v2803_v48, %v1729_v5 }
 0xa2f   :  { %v1738_v62 = vsel %vm1735_vm4, %v1737_v59, %v1733_v61 }
 0xa30   :  { %v1741_v63 = vmul.f32 %v1738_v62, %v1685_v36 }
 0xa32   :  { %v1743_v2 = vmul.f32 %v1741_v63, %v1699_v0 }
 0xa34   :  { %v1744_v6 = vpack.c.bf16 %v1743_v2, %v1742_v1 }
 0xa36   :  { %1818 = vmatmul.bf16.vlgmr.msra.gmra.mxu2 %v1744_v6 }
 0xab9   :  { %v1819_v8 = vpop.f32.mrf.mxu2 }
 0xaba   :  { %v1836_v10 = vmul.f32 %v1829_v7, %v1819_v8 }
 0xabc   :  { %v1838_v11 = vadd.f32 %v1836_v10, %v1824_v9 }
 0xabe   :  { %1840 = vst.msk [vmem:[#allocation2] sm:$0xff] %vm28_vm0, %v1838_v11 }
 0xac1   :  { %v1821_v13 = vpop.f32.mrf.mxu2 }
 0xac2   :  { %v1837_v15 = vmul.f32 %v1834_v12, %v1821_v13 }
 0xac4   :  { %v1839_v16 = vadd.f32 %v1837_v15, %v1825_v14 }
 0xac6   :  { %1841 = vst.msk [vmem:[#allocation2 + $0x8] sm:$0xff] %vm28_vm0, %v1839_v16 }
 0xac7 PF:  { %v1842_v17 = vld [vmem:[#allocation2] sm:$0xff]  ;;  %s1852_s29 = sshll.u32 %s3560_s5, 4  ;;  %s2854_s1 = smov [#allocation5]   ;;  %s1853_s29 = int_to_ptr.hbm [resolvable:$true] %s1852_s29 }
 0xac8   :  { %1844 = vst.msk [vmem:[#allocation5] sm:$0xff] %vm28_vm0, %v1842_v17  ;;  %s1850_s30 = sshll.u32 %s2854_s1, 4  ;;  %s2855_s6 = smov 128   ;;  %s1851_s30 = int_to_ptr.vmem [resolvable:$true] %s1850_s30 }
 0xac9   :  { %s2856_s7 = smov 8  }
 0xacd   :  { %v1843_v18 = vld [vmem:[#allocation2 + $0x8] sm:$0xff] }
 0xace   :  { %1845 = vst.msk [vmem:[#allocation5 + $0x8] sm:$0xff] %vm28_vm0, %v1843_v18 }
 0xacf   :  { %1858 = dma.vmem_to_hbm [thread:$0]  %s1851_s30, 256, %s1853_s29, [#allocation6], %s2855_s6, %s2855_s6, %s2856_s7  }
 0xad0   :  { %2842 = dma.done.wait [#allocation6], 256  }
 0xad1   :  { %2843 = vsyncadd [#allocation6], 4294967040 }
 0xad2   :  { %1863 = vsyncpa [#allocation6], 1 }

</bundles_post_ra>
